<compile_context>
chip_gen: v7x
topology: tpu7x:2x2x1
jax: 0.10.0
libtpu: 0.0.40
codegen_flags: <defaults>
</compile_context>

<pallas_src>
import functools

import jax
import jax.numpy as jnp
import numpy as np
from jax.experimental import pallas as pl
from jax.experimental.pallas import tpu as pltpu


def _round_up(x, m):
    return (x + m - 1) // m * m


def _row_view(P):
    # Row i of the logical (P, P) matrix is stored as an (S, L) tile with S * L == P.
    return (8, P // 8) if P % 8 == 0 else (1, P)


def _topology_kernel(idx_ref, aglim_ref, cmat_hbm, age_hbm,
                     cmat_ref, age_ref, dma_sem, *, batch, unroll):
    # cmat_ref / age_ref: (P, S, L); row i is ref[i] (leading-axis dynamic index = plain
    # address arithmetic, no dynamic sublane slicing).
    _, S, L = cmat_ref.shape

    agelimit = aglim_ref[0]          # scalar SMEM read before any DMA wait

    # Fill the resident state (the aliased output VMEM buffers) straight from HBM.
    cp_c = pltpu.make_async_copy(cmat_hbm, cmat_ref, dma_sem.at[0])
    cp_a = pltpu.make_async_copy(age_hbm, age_ref, dma_sem.at[1])
    cp_c.start()
    cp_a.start()
    cp_c.wait()
    cp_a.wait()

    # Flat column index of each element within a row (hoisted out of the loop).
    sub = jax.lax.broadcasted_iota(jnp.int32, (S, L), 0)
    lane = jax.lax.broadcasted_iota(jnp.int32, (S, L), 1)
    col = sub * L + lane

    def body(b, carry):
        # Precomputed winners for sample b (cheap scalar SMEM reads).
        i0 = idx_ref[2 * b]
        i1 = idx_ref[2 * b + 1]

        # 2-row read-modify-write (i0 != i1 by construction, so the two row-update
        # chains within one sample are independent).
        c0 = cmat_ref[i0]            # (S, L)
        c1 = cmat_ref[i1]
        a0 = age_ref[i0]
        a1 = age_ref[i1]

        m01 = col == i1              # column i1 within row i0
        m10 = col == i0              # column i0 within row i1

        # cmat[i0][i1] = 1 ; cmat[i1][i0] = 1   (cmat is exactly {0,1} -> max == set)
        c0 = jnp.maximum(c0, m01.astype(c0.dtype))
        c1 = jnp.maximum(c1, m10.astype(c1.dtype))

        # age[i0][i1] = 0 ; age[i1][i0] = 0 ; then age[iX][cmat[iX] == 1] += 1  ->  +c
        a0 = jnp.where(m01, 0.0, a0) + c0
        a1 = jnp.where(m10, 0.0, a1) + c1

        # cmat[iX][age[iX] > agelimit] = 0
        c0 = jnp.where(a0 > agelimit, 0.0, c0)
        c1 = jnp.where(a1 > agelimit, 0.0, c1)

        # Store the two rows back.
        cmat_ref[i0] = c0
        cmat_ref[i1] = c1
        age_ref[i0] = a0
        age_ref[i1] = a1
        return carry

    jax.lax.fori_loop(0, batch, body, 0, unroll=unroll)


@jax.jit
def connection_topology_forward(d, cmat, age, agelimit):
    """Returns updated (cmat, age) after sequentially processing all rows of d."""
    B, P = d.shape
    assert cmat.shape == (P, P) and age.shape == (P, P)

    # Batched winner selection (two smallest distances; lowest index wins ties).
    _, idx = jax.lax.top_k(-d.astype(jnp.float32), 2)          # (B, 2) int32
    idx_flat = idx.astype(jnp.int32).reshape(-1)                # (2B,) -> tiny 1-D SMEM
    aglim = jnp.reshape(jnp.asarray(agelimit, dtype=jnp.float32), (1,))

    # Lane/sublane-dense row view (layout-compatible reshape, no data movement).
    S, L = _row_view(P)
    cmat3 = cmat.astype(jnp.float32).reshape(P, S, L)
    age3 = age.astype(jnp.float32).reshape(P, S, L)

    # Scoped-VMEM sizing from the actual padded row tiles (only the two output state
    # buffers are VMEM-resident; inputs stay in HBM).
    row_bytes = _round_up(S, 8) * _round_up(L, 128) * 4
    state_bytes = 2 * P * row_bytes
    vmem_limit = int(min(max(state_bytes + (4 << 20), 16 << 20), 100 << 20))

    unroll = True if B <= 16 else 4
    kernel = functools.partial(_topology_kernel, batch=int(B), unroll=unroll)

    cmat_new, age_new = pl.pallas_call(
        kernel,
        out_shape=(jax.ShapeDtypeStruct((P, S, L), jnp.float32),
                   jax.ShapeDtypeStruct((P, S, L), jnp.float32)),
        in_specs=[
            pl.BlockSpec(memory_space=pltpu.MemorySpace.SMEM),   # winner indices
            pl.BlockSpec(memory_space=pltpu.MemorySpace.SMEM),   # agelimit scalar
            pl.BlockSpec(memory_space=pl.ANY),                   # cmat (stays in HBM)
            pl.BlockSpec(memory_space=pl.ANY),                   # age  (stays in HBM)
        ],
        out_specs=(pl.BlockSpec(memory_space=pltpu.MemorySpace.VMEM),
                   pl.BlockSpec(memory_space=pltpu.MemorySpace.VMEM)),
        scratch_shapes=[pltpu.SemaphoreType.DMA((2,))],
        # State arrives in (and is written back to) the same HBM buffers.
        input_output_aliases={2: 0, 3: 1},
        compiler_params=pltpu.CompilerParams(vmem_limit_bytes=vmem_limit),
    )(idx_flat, aglim, cmat3, age3)

    return cmat_new.reshape(P, P), age_new.reshape(P, P)


def _reference_numpy(d, cmat, age, agelimit):
    """Direct numpy port of the PyTorch forward for verification.

    Uses a stable argsort so tie-breaking (lowest index among equal distances) matches
    the kernel's top_k behavior; torch.argsort leaves ties unspecified anyway.
    """
    d = np.asarray(d)
    cmat = np.array(cmat, dtype=np.float32, copy=True)
    age = np.array(age, dtype=np.float32, copy=True)
    order = np.argsort(d, axis=1, kind="stable")
    for element in order:
        i0, i1 = int(element[0]), int(element[1])
        cmat[i0, i1] = 1
        cmat[i1, i0] = 1
        age[i0, i1] = 0
        age[i1, i0] = 0
        age[i0][cmat[i0] == 1] += 1
        age[i1][cmat[i1] == 1] += 1
        cmat[i0][age[i0] > agelimit] = 0
        cmat[i1][age[i1] > agelimit] = 0
    return cmat, age


if __name__ == "__main__":
    B = 8            # batch of samples
    P = 64           # num_prototypes
    AGELIMIT = 3

    key = jax.random.PRNGKey(0)
    d = jax.random.uniform(key, (B, P), dtype=jnp.float32)

    # Module __init__: cmat, age start as zeros (P, P)
    cmat0 = jnp.zeros((P, P), dtype=jnp.float32)
    age0 = jnp.zeros((P, P), dtype=jnp.float32)

    cmat_new, age_new = connection_topology_forward(d, cmat0, age0, AGELIMIT)
    cmat_new = jax.block_until_ready(cmat_new)
    age_new = jax.block_until_ready(age_new)

    cmat_ref, age_ref = _reference_numpy(np.asarray(d), np.asarray(cmat0),
                                         np.asarray(age0), AGELIMIT)

    np.testing.assert_allclose(np.asarray(cmat_new), cmat_ref, atol=0, rtol=0)
    np.testing.assert_allclose(np.asarray(age_new), age_ref, atol=0, rtol=0)

    print("KERNEL_OK")
</pallas_src>

<mosaic_0001>
module attributes {stable_mosaic.version = 11 : i64} {
  func.func @_topology_kernel(%arg0: memref<16xi32, #tpu.memory_space<smem>>, %arg1: memref<1xf32, #tpu.memory_space<smem>>, %arg2: memref<64x8x8xf32, #tpu.memory_space<any>>, %arg3: memref<64x8x8xf32, #tpu.memory_space<any>>, %arg4: memref<64x8x8xf32, #tpu.memory_space<vmem>>, %arg5: memref<64x8x8xf32, #tpu.memory_space<vmem>>, %arg6: memref<2x!tpu.dma_semaphore, #tpu.memory_space<semaphore_mem>>) attributes {dimension_semantics = [], scalar_prefetch = 0 : i64, scratch_operands = 1 : i64, tpu.core_type = #tpu.core_type<tc>} {
    %c0 = arith.constant 0 : index
    %0 = memref.load %arg1[%c0] : memref<1xf32, #tpu.memory_space<smem>>
    %c0_i32 = arith.constant 0 : i32
    %1 = tpu.memref_slice %arg6[%c0_i32] : memref<2x!tpu.dma_semaphore, #tpu.memory_space<semaphore_mem>> -> memref<1x!tpu.dma_semaphore, #tpu.memory_space<semaphore_mem>>
    %2 = tpu.memref_squeeze %1 : memref<1x!tpu.dma_semaphore, #tpu.memory_space<semaphore_mem>> -> memref<!tpu.dma_semaphore, #tpu.memory_space<semaphore_mem>>
    tpu.enqueue_dma source(%arg2 : memref<64x8x8xf32, #tpu.memory_space<any>>) target(%arg4 : memref<64x8x8xf32, #tpu.memory_space<vmem>>) target_semaphore(%2 : memref<!tpu.dma_semaphore, #tpu.memory_space<semaphore_mem>>)
    %c1_i32 = arith.constant 1 : i32
    %3 = tpu.memref_slice %arg6[%c1_i32] : memref<2x!tpu.dma_semaphore, #tpu.memory_space<semaphore_mem>> -> memref<1x!tpu.dma_semaphore, #tpu.memory_space<semaphore_mem>>
    %4 = tpu.memref_squeeze %3 : memref<1x!tpu.dma_semaphore, #tpu.memory_space<semaphore_mem>> -> memref<!tpu.dma_semaphore, #tpu.memory_space<semaphore_mem>>
    tpu.enqueue_dma source(%arg3 : memref<64x8x8xf32, #tpu.memory_space<any>>) target(%arg5 : memref<64x8x8xf32, #tpu.memory_space<vmem>>) target_semaphore(%4 : memref<!tpu.dma_semaphore, #tpu.memory_space<semaphore_mem>>)
    %c0_i32_0 = arith.constant 0 : i32
    %5 = tpu.memref_slice %arg6[%c0_i32_0] : memref<2x!tpu.dma_semaphore, #tpu.memory_space<semaphore_mem>> -> memref<1x!tpu.dma_semaphore, #tpu.memory_space<semaphore_mem>>
    %6 = tpu.memref_squeeze %5 : memref<1x!tpu.dma_semaphore, #tpu.memory_space<semaphore_mem>> -> memref<!tpu.dma_semaphore, #tpu.memory_space<semaphore_mem>>
    tpu.wait_dma2 semaphore(%6 : memref<!tpu.dma_semaphore, #tpu.memory_space<semaphore_mem>>) src(%arg2 : memref<64x8x8xf32, #tpu.memory_space<any>>) dst(%arg4 : memref<64x8x8xf32, #tpu.memory_space<vmem>>)
    %c1_i32_1 = arith.constant 1 : i32
    %7 = tpu.memref_slice %arg6[%c1_i32_1] : memref<2x!tpu.dma_semaphore, #tpu.memory_space<semaphore_mem>> -> memref<1x!tpu.dma_semaphore, #tpu.memory_space<semaphore_mem>>
    %8 = tpu.memref_squeeze %7 : memref<1x!tpu.dma_semaphore, #tpu.memory_space<semaphore_mem>> -> memref<!tpu.dma_semaphore, #tpu.memory_space<semaphore_mem>>
    tpu.wait_dma2 semaphore(%8 : memref<!tpu.dma_semaphore, #tpu.memory_space<semaphore_mem>>) src(%arg3 : memref<64x8x8xf32, #tpu.memory_space<any>>) dst(%arg5 : memref<64x8x8xf32, #tpu.memory_space<vmem>>)
    %9 = tpu.iota {dimensions = array<i32: 0>} : vector<8x8xi32>
    %10 = tpu.iota {dimensions = array<i32: 1>} : vector<8x8xi32>
    %c8_i32 = arith.constant 8 : i32
    %11 = vector.broadcast %c8_i32 : i32 to vector<8x8xi32>
    %12 = arith.muli %9, %11 : vector<8x8xi32>
    %13 = arith.addi %12, %10 : vector<8x8xi32>
    %c0_i32_2 = arith.constant 0 : i32
    %c2_i32 = arith.constant 2 : i32
    %14 = arith.muli %c2_i32, %c0_i32_2 : i32
    %15 = arith.index_cast %14 : i32 to index
    %16 = memref.load %arg0[%15] : memref<16xi32, #tpu.memory_space<smem>>
    %c2_i32_3 = arith.constant 2 : i32
    %17 = arith.muli %c2_i32_3, %c0_i32_2 : i32
    %c1_i32_4 = arith.constant 1 : i32
    %18 = arith.addi %17, %c1_i32_4 : i32
    %19 = arith.index_cast %18 : i32 to index
    %20 = memref.load %arg0[%19] : memref<16xi32, #tpu.memory_space<smem>>
    %21 = arith.index_cast %16 : i32 to index
    %c0_5 = arith.constant 0 : index
    %c0_6 = arith.constant 0 : index
    %22 = vector.load %arg4[%21, %c0_5, %c0_6] : memref<64x8x8xf32, #tpu.memory_space<vmem>>, vector<1x8x8xf32>
    %23 = vector.shape_cast %22 : vector<1x8x8xf32> to vector<8x8xf32>
    %24 = arith.index_cast %20 : i32 to index
    %c0_7 = arith.constant 0 : index
    %c0_8 = arith.constant 0 : index
    %25 = vector.load %arg4[%24, %c0_7, %c0_8] : memref<64x8x8xf32, #tpu.memory_space<vmem>>, vector<1x8x8xf32>
    %26 = vector.shape_cast %25 : vector<1x8x8xf32> to vector<8x8xf32>
    %27 = arith.index_cast %16 : i32 to index
    %c0_9 = arith.constant 0 : index
    %c0_10 = arith.constant 0 : index
    %28 = vector.load %arg5[%27, %c0_9, %c0_10] : memref<64x8x8xf32, #tpu.memory_space<vmem>>, vector<1x8x8xf32>
    %29 = vector.shape_cast %28 : vector<1x8x8xf32> to vector<8x8xf32>
    %30 = arith.index_cast %20 : i32 to index
    %c0_11 = arith.constant 0 : index
    %c0_12 = arith.constant 0 : index
    %31 = vector.load %arg5[%30, %c0_11, %c0_12] : memref<64x8x8xf32, #tpu.memory_space<vmem>>, vector<1x8x8xf32>
    %32 = vector.shape_cast %31 : vector<1x8x8xf32> to vector<8x8xf32>
    %33 = vector.broadcast %20 : i32 to vector<8x8xi32>
    %34 = arith.cmpi eq, %13, %33 : vector<8x8xi32>
    %35 = vector.broadcast %16 : i32 to vector<8x8xi32>
    %36 = arith.cmpi eq, %13, %35 : vector<8x8xi32>
    %37 = arith.extui %34 : vector<8x8xi1> to vector<8x8xi32>
    %38 = arith.sitofp %37 : vector<8x8xi32> to vector<8x8xf32>
    %39 = arith.maximumf %23, %38 : vector<8x8xf32>
    %40 = arith.extui %36 : vector<8x8xi1> to vector<8x8xi32>
    %41 = arith.sitofp %40 : vector<8x8xi32> to vector<8x8xf32>
    %42 = arith.maximumf %26, %41 : vector<8x8xf32>
    %cst = arith.constant 0.000000e+00 : f32
    %43 = vector.broadcast %cst : f32 to vector<8x8xf32>
    %44 = arith.select %34, %43, %29 : vector<8x8xi1>, vector<8x8xf32>
    %45 = arith.addf %44, %39 : vector<8x8xf32>
    %cst_13 = arith.constant 0.000000e+00 : f32
    %46 = vector.broadcast %cst_13 : f32 to vector<8x8xf32>
    %47 = arith.select %36, %46, %32 : vector<8x8xi1>, vector<8x8xf32>
    %48 = arith.addf %47, %42 : vector<8x8xf32>
    %49 = vector.broadcast %0 : f32 to vector<8x8xf32>
    %50 = arith.cmpf ogt, %45, %49 : vector<8x8xf32>
    %cst_14 = arith.constant 0.000000e+00 : f32
    %51 = vector.broadcast %cst_14 : f32 to vector<8x8xf32>
    %52 = arith.select %50, %51, %39 : vector<8x8xi1>, vector<8x8xf32>
    %53 = vector.broadcast %0 : f32 to vector<8x8xf32>
    %54 = arith.cmpf ogt, %48, %53 : vector<8x8xf32>
    %cst_15 = arith.constant 0.000000e+00 : f32
    %55 = vector.broadcast %cst_15 : f32 to vector<8x8xf32>
    %56 = arith.select %54, %55, %42 : vector<8x8xi1>, vector<8x8xf32>
    %57 = arith.index_cast %16 : i32 to index
    %c0_16 = arith.constant 0 : index
    %c0_17 = arith.constant 0 : index
    %58 = vector.load %arg4[%57, %c0_16, %c0_17] : memref<64x8x8xf32, #tpu.memory_space<vmem>>, vector<1x8x8xf32>
    %59 = vector.shape_cast %58 : vector<1x8x8xf32> to vector<8x8xf32>
    %60 = vector.shape_cast %52 : vector<8x8xf32> to vector<1x8x8xf32>
    tpu.vector_store %arg4[%57, %c0_16, %c0_17], %60 {strides = array<i32>} : memref<64x8x8xf32, #tpu.memory_space<vmem>>, vector<1x8x8xf32>,
    %61 = arith.index_cast %20 : i32 to index
    %c0_18 = arith.constant 0 : index
    %c0_19 = arith.constant 0 : index
    %62 = vector.load %arg4[%61, %c0_18, %c0_19] : memref<64x8x8xf32, #tpu.memory_space<vmem>>, vector<1x8x8xf32>
    %63 = vector.shape_cast %62 : vector<1x8x8xf32> to vector<8x8xf32>
    %64 = vector.shape_cast %56 : vector<8x8xf32> to vector<1x8x8xf32>
    tpu.vector_store %arg4[%61, %c0_18, %c0_19], %64 {strides = array<i32>} : memref<64x8x8xf32, #tpu.memory_space<vmem>>, vector<1x8x8xf32>,
    %65 = arith.index_cast %16 : i32 to index
    %c0_20 = arith.constant 0 : index
    %c0_21 = arith.constant 0 : index
    %66 = vector.load %arg5[%65, %c0_20, %c0_21] : memref<64x8x8xf32, #tpu.memory_space<vmem>>, vector<1x8x8xf32>
    %67 = vector.shape_cast %66 : vector<1x8x8xf32> to vector<8x8xf32>
    %68 = vector.shape_cast %45 : vector<8x8xf32> to vector<1x8x8xf32>
    tpu.vector_store %arg5[%65, %c0_20, %c0_21], %68 {strides = array<i32>} : memref<64x8x8xf32, #tpu.memory_space<vmem>>, vector<1x8x8xf32>,
    %69 = arith.index_cast %20 : i32 to index
    %c0_22 = arith.constant 0 : index
    %c0_23 = arith.constant 0 : index
    %70 = vector.load %arg5[%69, %c0_22, %c0_23] : memref<64x8x8xf32, #tpu.memory_space<vmem>>, vector<1x8x8xf32>
    %71 = vector.shape_cast %70 : vector<1x8x8xf32> to vector<8x8xf32>
    %72 = vector.shape_cast %48 : vector<8x8xf32> to vector<1x8x8xf32>
    tpu.vector_store %arg5[%69, %c0_22, %c0_23], %72 {strides = array<i32>} : memref<64x8x8xf32, #tpu.memory_space<vmem>>, vector<1x8x8xf32>,
    %c1_i32_24 = arith.constant 1 : i32
    %c2_i32_25 = arith.constant 2 : i32
    %73 = arith.muli %c2_i32_25, %c1_i32_24 : i32
    %74 = arith.index_cast %73 : i32 to index
    %75 = memref.load %arg0[%74] : memref<16xi32, #tpu.memory_space<smem>>
    %c2_i32_26 = arith.constant 2 : i32
    %76 = arith.muli %c2_i32_26, %c1_i32_24 : i32
    %c1_i32_27 = arith.constant 1 : i32
    %77 = arith.addi %76, %c1_i32_27 : i32
    %78 = arith.index_cast %77 : i32 to index
    %79 = memref.load %arg0[%78] : memref<16xi32, #tpu.memory_space<smem>>
    %80 = arith.index_cast %75 : i32 to index
    %c0_28 = arith.constant 0 : index
    %c0_29 = arith.constant 0 : index
    %81 = vector.load %arg4[%80, %c0_28, %c0_29] : memref<64x8x8xf32, #tpu.memory_space<vmem>>, vector<1x8x8xf32>
    %82 = vector.shape_cast %81 : vector<1x8x8xf32> to vector<8x8xf32>
    %83 = arith.index_cast %79 : i32 to index
    %c0_30 = arith.constant 0 : index
    %c0_31 = arith.constant 0 : index
    %84 = vector.load %arg4[%83, %c0_30, %c0_31] : memref<64x8x8xf32, #tpu.memory_space<vmem>>, vector<1x8x8xf32>
    %85 = vector.shape_cast %84 : vector<1x8x8xf32> to vector<8x8xf32>
    %86 = arith.index_cast %75 : i32 to index
    %c0_32 = arith.constant 0 : index
    %c0_33 = arith.constant 0 : index
    %87 = vector.load %arg5[%86, %c0_32, %c0_33] : memref<64x8x8xf32, #tpu.memory_space<vmem>>, vector<1x8x8xf32>
    %88 = vector.shape_cast %87 : vector<1x8x8xf32> to vector<8x8xf32>
    %89 = arith.index_cast %79 : i32 to index
    %c0_34 = arith.constant 0 : index
    %c0_35 = arith.constant 0 : index
    %90 = vector.load %arg5[%89, %c0_34, %c0_35] : memref<64x8x8xf32, #tpu.memory_space<vmem>>, vector<1x8x8xf32>
    %91 = vector.shape_cast %90 : vector<1x8x8xf32> to vector<8x8xf32>
    %92 = vector.broadcast %79 : i32 to vector<8x8xi32>
    %93 = arith.cmpi eq, %13, %92 : vector<8x8xi32>
    %94 = vector.broadcast %75 : i32 to vector<8x8xi32>
    %95 = arith.cmpi eq, %13, %94 : vector<8x8xi32>
    %96 = arith.extui %93 : vector<8x8xi1> to vector<8x8xi32>
    %97 = arith.sitofp %96 : vector<8x8xi32> to vector<8x8xf32>
    %98 = arith.maximumf %82, %97 : vector<8x8xf32>
    %99 = arith.extui %95 : vector<8x8xi1> to vector<8x8xi32>
    %100 = arith.sitofp %99 : vector<8x8xi32> to vector<8x8xf32>
    %101 = arith.maximumf %85, %100 : vector<8x8xf32>
    %cst_36 = arith.constant 0.000000e+00 : f32
    %102 = vector.broadcast %cst_36 : f32 to vector<8x8xf32>
    %103 = arith.select %93, %102, %88 : vector<8x8xi1>, vector<8x8xf32>
    %104 = arith.addf %103, %98 : vector<8x8xf32>
    %cst_37 = arith.constant 0.000000e+00 : f32
    %105 = vector.broadcast %cst_37 : f32 to vector<8x8xf32>
    %106 = arith.select %95, %105, %91 : vector<8x8xi1>, vector<8x8xf32>
    %107 = arith.addf %106, %101 : vector<8x8xf32>
    %108 = vector.broadcast %0 : f32 to vector<8x8xf32>
    %109 = arith.cmpf ogt, %104, %108 : vector<8x8xf32>
    %cst_38 = arith.constant 0.000000e+00 : f32
    %110 = vector.broadcast %cst_38 : f32 to vector<8x8xf32>
    %111 = arith.select %109, %110, %98 : vector<8x8xi1>, vector<8x8xf32>
    %112 = vector.broadcast %0 : f32 to vector<8x8xf32>
    %113 = arith.cmpf ogt, %107, %112 : vector<8x8xf32>
    %cst_39 = arith.constant 0.000000e+00 : f32
    %114 = vector.broadcast %cst_39 : f32 to vector<8x8xf32>
    %115 = arith.select %113, %114, %101 : vector<8x8xi1>, vector<8x8xf32>
    %116 = arith.index_cast %75 : i32 to index
    %c0_40 = arith.constant 0 : index
    %c0_41 = arith.constant 0 : index
    %117 = vector.load %arg4[%116, %c0_40, %c0_41] : memref<64x8x8xf32, #tpu.memory_space<vmem>>, vector<1x8x8xf32>
    %118 = vector.shape_cast %117 : vector<1x8x8xf32> to vector<8x8xf32>
    %119 = vector.shape_cast %111 : vector<8x8xf32> to vector<1x8x8xf32>
    tpu.vector_store %arg4[%116, %c0_40, %c0_41], %119 {strides = array<i32>} : memref<64x8x8xf32, #tpu.memory_space<vmem>>, vector<1x8x8xf32>,
    %120 = arith.index_cast %79 : i32 to index
    %c0_42 = arith.constant 0 : index
    %c0_43 = arith.constant 0 : index
    %121 = vector.load %arg4[%120, %c0_42, %c0_43] : memref<64x8x8xf32, #tpu.memory_space<vmem>>, vector<1x8x8xf32>
    %122 = vector.shape_cast %121 : vector<1x8x8xf32> to vector<8x8xf32>
    %123 = vector.shape_cast %115 : vector<8x8xf32> to vector<1x8x8xf32>
    tpu.vector_store %arg4[%120, %c0_42, %c0_43], %123 {strides = array<i32>} : memref<64x8x8xf32, #tpu.memory_space<vmem>>, vector<1x8x8xf32>,
    %124 = arith.index_cast %75 : i32 to index
    %c0_44 = arith.constant 0 : index
    %c0_45 = arith.constant 0 : index
    %125 = vector.load %arg5[%124, %c0_44, %c0_45] : memref<64x8x8xf32, #tpu.memory_space<vmem>>, vector<1x8x8xf32>
    %126 = vector.shape_cast %125 : vector<1x8x8xf32> to vector<8x8xf32>
    %127 = vector.shape_cast %104 : vector<8x8xf32> to vector<1x8x8xf32>
    tpu.vector_store %arg5[%124, %c0_44, %c0_45], %127 {strides = array<i32>} : memref<64x8x8xf32, #tpu.memory_space<vmem>>, vector<1x8x8xf32>,
    %128 = arith.index_cast %79 : i32 to index
    %c0_46 = arith.constant 0 : index
    %c0_47 = arith.constant 0 : index
    %129 = vector.load %arg5[%128, %c0_46, %c0_47] : memref<64x8x8xf32, #tpu.memory_space<vmem>>, vector<1x8x8xf32>
    %130 = vector.shape_cast %129 : vector<1x8x8xf32> to vector<8x8xf32>
    %131 = vector.shape_cast %107 : vector<8x8xf32> to vector<1x8x8xf32>
    tpu.vector_store %arg5[%128, %c0_46, %c0_47], %131 {strides = array<i32>} : memref<64x8x8xf32, #tpu.memory_space<vmem>>, vector<1x8x8xf32>,
    %c2_i32_48 = arith.constant 2 : i32
    %c2_i32_49 = arith.constant 2 : i32
    %132 = arith.muli %c2_i32_49, %c2_i32_48 : i32
    %133 = arith.index_cast %132 : i32 to index
    %134 = memref.load %arg0[%133] : memref<16xi32, #tpu.memory_space<smem>>
    %c2_i32_50 = arith.constant 2 : i32
    %135 = arith.muli %c2_i32_50, %c2_i32_48 : i32
    %c1_i32_51 = arith.constant 1 : i32
    %136 = arith.addi %135, %c1_i32_51 : i32
    %137 = arith.index_cast %136 : i32 to index
    %138 = memref.load %arg0[%137] : memref<16xi32, #tpu.memory_space<smem>>
    %139 = arith.index_cast %134 : i32 to index
    %c0_52 = arith.constant 0 : index
    %c0_53 = arith.constant 0 : index
    %140 = vector.load %arg4[%139, %c0_52, %c0_53] : memref<64x8x8xf32, #tpu.memory_space<vmem>>, vector<1x8x8xf32>
    %141 = vector.shape_cast %140 : vector<1x8x8xf32> to vector<8x8xf32>
    %142 = arith.index_cast %138 : i32 to index
    %c0_54 = arith.constant 0 : index
    %c0_55 = arith.constant 0 : index
    %143 = vector.load %arg4[%142, %c0_54, %c0_55] : memref<64x8x8xf32, #tpu.memory_space<vmem>>, vector<1x8x8xf32>
    %144 = vector.shape_cast %143 : vector<1x8x8xf32> to vector<8x8xf32>
    %145 = arith.index_cast %134 : i32 to index
    %c0_56 = arith.constant 0 : index
    %c0_57 = arith.constant 0 : index
    %146 = vector.load %arg5[%145, %c0_56, %c0_57] : memref<64x8x8xf32, #tpu.memory_space<vmem>>, vector<1x8x8xf32>
    %147 = vector.shape_cast %146 : vector<1x8x8xf32> to vector<8x8xf32>
    %148 = arith.index_cast %138 : i32 to index
    %c0_58 = arith.constant 0 : index
    %c0_59 = arith.constant 0 : index
    %149 = vector.load %arg5[%148, %c0_58, %c0_59] : memref<64x8x8xf32, #tpu.memory_space<vmem>>, vector<1x8x8xf32>
    %150 = vector.shape_cast %149 : vector<1x8x8xf32> to vector<8x8xf32>
    %151 = vector.broadcast %138 : i32 to vector<8x8xi32>
    %152 = arith.cmpi eq, %13, %151 : vector<8x8xi32>
    %153 = vector.broadcast %134 : i32 to vector<8x8xi32>
    %154 = arith.cmpi eq, %13, %153 : vector<8x8xi32>
    %155 = arith.extui %152 : vector<8x8xi1> to vector<8x8xi32>
    %156 = arith.sitofp %155 : vector<8x8xi32> to vector<8x8xf32>
    %157 = arith.maximumf %141, %156 : vector<8x8xf32>
    %158 = arith.extui %154 : vector<8x8xi1> to vector<8x8xi32>
    %159 = arith.sitofp %158 : vector<8x8xi32> to vector<8x8xf32>
    %160 = arith.maximumf %144, %159 : vector<8x8xf32>
    %cst_60 = arith.constant 0.000000e+00 : f32
    %161 = vector.broadcast %cst_60 : f32 to vector<8x8xf32>
    %162 = arith.select %152, %161, %147 : vector<8x8xi1>, vector<8x8xf32>
    %163 = arith.addf %162, %157 : vector<8x8xf32>
    %cst_61 = arith.constant 0.000000e+00 : f32
    %164 = vector.broadcast %cst_61 : f32 to vector<8x8xf32>
    %165 = arith.select %154, %164, %150 : vector<8x8xi1>, vector<8x8xf32>
    %166 = arith.addf %165, %160 : vector<8x8xf32>
    %167 = vector.broadcast %0 : f32 to vector<8x8xf32>
    %168 = arith.cmpf ogt, %163, %167 : vector<8x8xf32>
    %cst_62 = arith.constant 0.000000e+00 : f32
    %169 = vector.broadcast %cst_62 : f32 to vector<8x8xf32>
    %170 = arith.select %168, %169, %157 : vector<8x8xi1>, vector<8x8xf32>
    %171 = vector.broadcast %0 : f32 to vector<8x8xf32>
    %172 = arith.cmpf ogt, %166, %171 : vector<8x8xf32>
    %cst_63 = arith.constant 0.000000e+00 : f32
    %173 = vector.broadcast %cst_63 : f32 to vector<8x8xf32>
    %174 = arith.select %172, %173, %160 : vector<8x8xi1>, vector<8x8xf32>
    %175 = arith.index_cast %134 : i32 to index
    %c0_64 = arith.constant 0 : index
    %c0_65 = arith.constant 0 : index
    %176 = vector.load %arg4[%175, %c0_64, %c0_65] : memref<64x8x8xf32, #tpu.memory_space<vmem>>, vector<1x8x8xf32>
    %177 = vector.shape_cast %176 : vector<1x8x8xf32> to vector<8x8xf32>
    %178 = vector.shape_cast %170 : vector<8x8xf32> to vector<1x8x8xf32>
    tpu.vector_store %arg4[%175, %c0_64, %c0_65], %178 {strides = array<i32>} : memref<64x8x8xf32, #tpu.memory_space<vmem>>, vector<1x8x8xf32>,
    %179 = arith.index_cast %138 : i32 to index
    %c0_66 = arith.constant 0 : index
    %c0_67 = arith.constant 0 : index
    %180 = vector.load %arg4[%179, %c0_66, %c0_67] : memref<64x8x8xf32, #tpu.memory_space<vmem>>, vector<1x8x8xf32>
    %181 = vector.shape_cast %180 : vector<1x8x8xf32> to vector<8x8xf32>
    %182 = vector.shape_cast %174 : vector<8x8xf32> to vector<1x8x8xf32>
    tpu.vector_store %arg4[%179, %c0_66, %c0_67], %182 {strides = array<i32>} : memref<64x8x8xf32, #tpu.memory_space<vmem>>, vector<1x8x8xf32>,
    %183 = arith.index_cast %134 : i32 to index
    %c0_68 = arith.constant 0 : index
    %c0_69 = arith.constant 0 : index
    %184 = vector.load %arg5[%183, %c0_68, %c0_69] : memref<64x8x8xf32, #tpu.memory_space<vmem>>, vector<1x8x8xf32>
    %185 = vector.shape_cast %184 : vector<1x8x8xf32> to vector<8x8xf32>
    %186 = vector.shape_cast %163 : vector<8x8xf32> to vector<1x8x8xf32>
    tpu.vector_store %arg5[%183, %c0_68, %c0_69], %186 {strides = array<i32>} : memref<64x8x8xf32, #tpu.memory_space<vmem>>, vector<1x8x8xf32>,
    %187 = arith.index_cast %138 : i32 to index
    %c0_70 = arith.constant 0 : index
    %c0_71 = arith.constant 0 : index
    %188 = vector.load %arg5[%187, %c0_70, %c0_71] : memref<64x8x8xf32, #tpu.memory_space<vmem>>, vector<1x8x8xf32>
    %189 = vector.shape_cast %188 : vector<1x8x8xf32> to vector<8x8xf32>
    %190 = vector.shape_cast %166 : vector<8x8xf32> to vector<1x8x8xf32>
    tpu.vector_store %arg5[%187, %c0_70, %c0_71], %190 {strides = array<i32>} : memref<64x8x8xf32, #tpu.memory_space<vmem>>, vector<1x8x8xf32>,
    %c3_i32 = arith.constant 3 : i32
    %c2_i32_72 = arith.constant 2 : i32
    %191 = arith.muli %c2_i32_72, %c3_i32 : i32
    %192 = arith.index_cast %191 : i32 to index
    %193 = memref.load %arg0[%192] : memref<16xi32, #tpu.memory_space<smem>>
    %c2_i32_73 = arith.constant 2 : i32
    %194 = arith.muli %c2_i32_73, %c3_i32 : i32
    %c1_i32_74 = arith.constant 1 : i32
    %195 = arith.addi %194, %c1_i32_74 : i32
    %196 = arith.index_cast %195 : i32 to index
    %197 = memref.load %arg0[%196] : memref<16xi32, #tpu.memory_space<smem>>
    %198 = arith.index_cast %193 : i32 to index
    %c0_75 = arith.constant 0 : index
    %c0_76 = arith.constant 0 : index
    %199 = vector.load %arg4[%198, %c0_75, %c0_76] : memref<64x8x8xf32, #tpu.memory_space<vmem>>, vector<1x8x8xf32>
    %200 = vector.shape_cast %199 : vector<1x8x8xf32> to vector<8x8xf32>
    %201 = arith.index_cast %197 : i32 to index
    %c0_77 = arith.constant 0 : index
    %c0_78 = arith.constant 0 : index
    %202 = vector.load %arg4[%201, %c0_77, %c0_78] : memref<64x8x8xf32, #tpu.memory_space<vmem>>, vector<1x8x8xf32>
    %203 = vector.shape_cast %202 : vector<1x8x8xf32> to vector<8x8xf32>
    %204 = arith.index_cast %193 : i32 to index
    %c0_79 = arith.constant 0 : index
    %c0_80 = arith.constant 0 : index
    %205 = vector.load %arg5[%204, %c0_79, %c0_80] : memref<64x8x8xf32, #tpu.memory_space<vmem>>, vector<1x8x8xf32>
    %206 = vector.shape_cast %205 : vector<1x8x8xf32> to vector<8x8xf32>
    %207 = arith.index_cast %197 : i32 to index
    %c0_81 = arith.constant 0 : index
    %c0_82 = arith.constant 0 : index
    %208 = vector.load %arg5[%207, %c0_81, %c0_82] : memref<64x8x8xf32, #tpu.memory_space<vmem>>, vector<1x8x8xf32>
    %209 = vector.shape_cast %208 : vector<1x8x8xf32> to vector<8x8xf32>
    %210 = vector.broadcast %197 : i32 to vector<8x8xi32>
    %211 = arith.cmpi eq, %13, %210 : vector<8x8xi32>
    %212 = vector.broadcast %193 : i32 to vector<8x8xi32>
    %213 = arith.cmpi eq, %13, %212 : vector<8x8xi32>
    %214 = arith.extui %211 : vector<8x8xi1> to vector<8x8xi32>
    %215 = arith.sitofp %214 : vector<8x8xi32> to vector<8x8xf32>
    %216 = arith.maximumf %200, %215 : vector<8x8xf32>
    %217 = arith.extui %213 : vector<8x8xi1> to vector<8x8xi32>
    %218 = arith.sitofp %217 : vector<8x8xi32> to vector<8x8xf32>
    %219 = arith.maximumf %203, %218 : vector<8x8xf32>
    %cst_83 = arith.constant 0.000000e+00 : f32
    %220 = vector.broadcast %cst_83 : f32 to vector<8x8xf32>
    %221 = arith.select %211, %220, %206 : vector<8x8xi1>, vector<8x8xf32>
    %222 = arith.addf %221, %216 : vector<8x8xf32>
    %cst_84 = arith.constant 0.000000e+00 : f32
    %223 = vector.broadcast %cst_84 : f32 to vector<8x8xf32>
    %224 = arith.select %213, %223, %209 : vector<8x8xi1>, vector<8x8xf32>
    %225 = arith.addf %224, %219 : vector<8x8xf32>
    %226 = vector.broadcast %0 : f32 to vector<8x8xf32>
    %227 = arith.cmpf ogt, %222, %226 : vector<8x8xf32>
    %cst_85 = arith.constant 0.000000e+00 : f32
    %228 = vector.broadcast %cst_85 : f32 to vector<8x8xf32>
    %229 = arith.select %227, %228, %216 : vector<8x8xi1>, vector<8x8xf32>
    %230 = vector.broadcast %0 : f32 to vector<8x8xf32>
    %231 = arith.cmpf ogt, %225, %230 : vector<8x8xf32>
    %cst_86 = arith.constant 0.000000e+00 : f32
    %232 = vector.broadcast %cst_86 : f32 to vector<8x8xf32>
    %233 = arith.select %231, %232, %219 : vector<8x8xi1>, vector<8x8xf32>
    %234 = arith.index_cast %193 : i32 to index
    %c0_87 = arith.constant 0 : index
    %c0_88 = arith.constant 0 : index
    %235 = vector.load %arg4[%234, %c0_87, %c0_88] : memref<64x8x8xf32, #tpu.memory_space<vmem>>, vector<1x8x8xf32>
    %236 = vector.shape_cast %235 : vector<1x8x8xf32> to vector<8x8xf32>
    %237 = vector.shape_cast %229 : vector<8x8xf32> to vector<1x8x8xf32>
    tpu.vector_store %arg4[%234, %c0_87, %c0_88], %237 {strides = array<i32>} : memref<64x8x8xf32, #tpu.memory_space<vmem>>, vector<1x8x8xf32>,
    %238 = arith.index_cast %197 : i32 to index
    %c0_89 = arith.constant 0 : index
    %c0_90 = arith.constant 0 : index
    %239 = vector.load %arg4[%238, %c0_89, %c0_90] : memref<64x8x8xf32, #tpu.memory_space<vmem>>, vector<1x8x8xf32>
    %240 = vector.shape_cast %239 : vector<1x8x8xf32> to vector<8x8xf32>
    %241 = vector.shape_cast %233 : vector<8x8xf32> to vector<1x8x8xf32>
    tpu.vector_store %arg4[%238, %c0_89, %c0_90], %241 {strides = array<i32>} : memref<64x8x8xf32, #tpu.memory_space<vmem>>, vector<1x8x8xf32>,
    %242 = arith.index_cast %193 : i32 to index
    %c0_91 = arith.constant 0 : index
    %c0_92 = arith.constant 0 : index
    %243 = vector.load %arg5[%242, %c0_91, %c0_92] : memref<64x8x8xf32, #tpu.memory_space<vmem>>, vector<1x8x8xf32>
    %244 = vector.shape_cast %243 : vector<1x8x8xf32> to vector<8x8xf32>
    %245 = vector.shape_cast %222 : vector<8x8xf32> to vector<1x8x8xf32>
    tpu.vector_store %arg5[%242, %c0_91, %c0_92], %245 {strides = array<i32>} : memref<64x8x8xf32, #tpu.memory_space<vmem>>, vector<1x8x8xf32>,
    %246 = arith.index_cast %197 : i32 to index
    %c0_93 = arith.constant 0 : index
    %c0_94 = arith.constant 0 : index
    %247 = vector.load %arg5[%246, %c0_93, %c0_94] : memref<64x8x8xf32, #tpu.memory_space<vmem>>, vector<1x8x8xf32>
    %248 = vector.shape_cast %247 : vector<1x8x8xf32> to vector<8x8xf32>
    %249 = vector.shape_cast %225 : vector<8x8xf32> to vector<1x8x8xf32>
    tpu.vector_store %arg5[%246, %c0_93, %c0_94], %249 {strides = array<i32>} : memref<64x8x8xf32, #tpu.memory_space<vmem>>, vector<1x8x8xf32>,
    %c4_i32 = arith.constant 4 : i32
    %c2_i32_95 = arith.constant 2 : i32
    %250 = arith.muli %c2_i32_95, %c4_i32 : i32
    %251 = arith.index_cast %250 : i32 to index
    %252 = memref.load %arg0[%251] : memref<16xi32, #tpu.memory_space<smem>>
    %c2_i32_96 = arith.constant 2 : i32
    %253 = arith.muli %c2_i32_96, %c4_i32 : i32
    %c1_i32_97 = arith.constant 1 : i32
    %254 = arith.addi %253, %c1_i32_97 : i32
    %255 = arith.index_cast %254 : i32 to index
    %256 = memref.load %arg0[%255] : memref<16xi32, #tpu.memory_space<smem>>
    %257 = arith.index_cast %252 : i32 to index
    %c0_98 = arith.constant 0 : index
    %c0_99 = arith.constant 0 : index
    %258 = vector.load %arg4[%257, %c0_98, %c0_99] : memref<64x8x8xf32, #tpu.memory_space<vmem>>, vector<1x8x8xf32>
    %259 = vector.shape_cast %258 : vector<1x8x8xf32> to vector<8x8xf32>
    %260 = arith.index_cast %256 : i32 to index
    %c0_100 = arith.constant 0 : index
    %c0_101 = arith.constant 0 : index
    %261 = vector.load %arg4[%260, %c0_100, %c0_101] : memref<64x8x8xf32, #tpu.memory_space<vmem>>, vector<1x8x8xf32>
    %262 = vector.shape_cast %261 : vector<1x8x8xf32> to vector<8x8xf32>
    %263 = arith.index_cast %252 : i32 to index
    %c0_102 = arith.constant 0 : index
    %c0_103 = arith.constant 0 : index
    %264 = vector.load %arg5[%263, %c0_102, %c0_103] : memref<64x8x8xf32, #tpu.memory_space<vmem>>, vector<1x8x8xf32>
    %265 = vector.shape_cast %264 : vector<1x8x8xf32> to vector<8x8xf32>
    %266 = arith.index_cast %256 : i32 to index
    %c0_104 = arith.constant 0 : index
    %c0_105 = arith.constant 0 : index
    %267 = vector.load %arg5[%266, %c0_104, %c0_105] : memref<64x8x8xf32, #tpu.memory_space<vmem>>, vector<1x8x8xf32>
    %268 = vector.shape_cast %267 : vector<1x8x8xf32> to vector<8x8xf32>
    %269 = vector.broadcast %256 : i32 to vector<8x8xi32>
    %270 = arith.cmpi eq, %13, %269 : vector<8x8xi32>
    %271 = vector.broadcast %252 : i32 to vector<8x8xi32>
    %272 = arith.cmpi eq, %13, %271 : vector<8x8xi32>
    %273 = arith.extui %270 : vector<8x8xi1> to vector<8x8xi32>
    %274 = arith.sitofp %273 : vector<8x8xi32> to vector<8x8xf32>
    %275 = arith.maximumf %259, %274 : vector<8x8xf32>
    %276 = arith.extui %272 : vector<8x8xi1> to vector<8x8xi32>
    %277 = arith.sitofp %276 : vector<8x8xi32> to vector<8x8xf32>
    %278 = arith.maximumf %262, %277 : vector<8x8xf32>
    %cst_106 = arith.constant 0.000000e+00 : f32
    %279 = vector.broadcast %cst_106 : f32 to vector<8x8xf32>
    %280 = arith.select %270, %279, %265 : vector<8x8xi1>, vector<8x8xf32>
    %281 = arith.addf %280, %275 : vector<8x8xf32>
    %cst_107 = arith.constant 0.000000e+00 : f32
    %282 = vector.broadcast %cst_107 : f32 to vector<8x8xf32>
    %283 = arith.select %272, %282, %268 : vector<8x8xi1>, vector<8x8xf32>
    %284 = arith.addf %283, %278 : vector<8x8xf32>
    %285 = vector.broadcast %0 : f32 to vector<8x8xf32>
    %286 = arith.cmpf ogt, %281, %285 : vector<8x8xf32>
    %cst_108 = arith.constant 0.000000e+00 : f32
    %287 = vector.broadcast %cst_108 : f32 to vector<8x8xf32>
    %288 = arith.select %286, %287, %275 : vector<8x8xi1>, vector<8x8xf32>
    %289 = vector.broadcast %0 : f32 to vector<8x8xf32>
    %290 = arith.cmpf ogt, %284, %289 : vector<8x8xf32>
    %cst_109 = arith.constant 0.000000e+00 : f32
    %291 = vector.broadcast %cst_109 : f32 to vector<8x8xf32>
    %292 = arith.select %290, %291, %278 : vector<8x8xi1>, vector<8x8xf32>
    %293 = arith.index_cast %252 : i32 to index
    %c0_110 = arith.constant 0 : index
    %c0_111 = arith.constant 0 : index
    %294 = vector.load %arg4[%293, %c0_110, %c0_111] : memref<64x8x8xf32, #tpu.memory_space<vmem>>, vector<1x8x8xf32>
    %295 = vector.shape_cast %294 : vector<1x8x8xf32> to vector<8x8xf32>
    %296 = vector.shape_cast %288 : vector<8x8xf32> to vector<1x8x8xf32>
    tpu.vector_store %arg4[%293, %c0_110, %c0_111], %296 {strides = array<i32>} : memref<64x8x8xf32, #tpu.memory_space<vmem>>, vector<1x8x8xf32>,
    %297 = arith.index_cast %256 : i32 to index
    %c0_112 = arith.constant 0 : index
    %c0_113 = arith.constant 0 : index
    %298 = vector.load %arg4[%297, %c0_112, %c0_113] : memref<64x8x8xf32, #tpu.memory_space<vmem>>, vector<1x8x8xf32>
    %299 = vector.shape_cast %298 : vector<1x8x8xf32> to vector<8x8xf32>
    %300 = vector.shape_cast %292 : vector<8x8xf32> to vector<1x8x8xf32>
    tpu.vector_store %arg4[%297, %c0_112, %c0_113], %300 {strides = array<i32>} : memref<64x8x8xf32, #tpu.memory_space<vmem>>, vector<1x8x8xf32>,
    %301 = arith.index_cast %252 : i32 to index
    %c0_114 = arith.constant 0 : index
    %c0_115 = arith.constant 0 : index
    %302 = vector.load %arg5[%301, %c0_114, %c0_115] : memref<64x8x8xf32, #tpu.memory_space<vmem>>, vector<1x8x8xf32>
    %303 = vector.shape_cast %302 : vector<1x8x8xf32> to vector<8x8xf32>
    %304 = vector.shape_cast %281 : vector<8x8xf32> to vector<1x8x8xf32>
    tpu.vector_store %arg5[%301, %c0_114, %c0_115], %304 {strides = array<i32>} : memref<64x8x8xf32, #tpu.memory_space<vmem>>, vector<1x8x8xf32>,
    %305 = arith.index_cast %256 : i32 to index
    %c0_116 = arith.constant 0 : index
    %c0_117 = arith.constant 0 : index
    %306 = vector.load %arg5[%305, %c0_116, %c0_117] : memref<64x8x8xf32, #tpu.memory_space<vmem>>, vector<1x8x8xf32>
    %307 = vector.shape_cast %306 : vector<1x8x8xf32> to vector<8x8xf32>
    %308 = vector.shape_cast %284 : vector<8x8xf32> to vector<1x8x8xf32>
    tpu.vector_store %arg5[%305, %c0_116, %c0_117], %308 {strides = array<i32>} : memref<64x8x8xf32, #tpu.memory_space<vmem>>, vector<1x8x8xf32>,
    %c5_i32 = arith.constant 5 : i32
    %c2_i32_118 = arith.constant 2 : i32
    %309 = arith.muli %c2_i32_118, %c5_i32 : i32
    %310 = arith.index_cast %309 : i32 to index
    %311 = memref.load %arg0[%310] : memref<16xi32, #tpu.memory_space<smem>>
    %c2_i32_119 = arith.constant 2 : i32
    %312 = arith.muli %c2_i32_119, %c5_i32 : i32
    %c1_i32_120 = arith.constant 1 : i32
    %313 = arith.addi %312, %c1_i32_120 : i32
    %314 = arith.index_cast %313 : i32 to index
    %315 = memref.load %arg0[%314] : memref<16xi32, #tpu.memory_space<smem>>
    %316 = arith.index_cast %311 : i32 to index
    %c0_121 = arith.constant 0 : index
    %c0_122 = arith.constant 0 : index
    %317 = vector.load %arg4[%316, %c0_121, %c0_122] : memref<64x8x8xf32, #tpu.memory_space<vmem>>, vector<1x8x8xf32>
    %318 = vector.shape_cast %317 : vector<1x8x8xf32> to vector<8x8xf32>
    %319 = arith.index_cast %315 : i32 to index
    %c0_123 = arith.constant 0 : index
    %c0_124 = arith.constant 0 : index
    %320 = vector.load %arg4[%319, %c0_123, %c0_124] : memref<64x8x8xf32, #tpu.memory_space<vmem>>, vector<1x8x8xf32>
    %321 = vector.shape_cast %320 : vector<1x8x8xf32> to vector<8x8xf32>
    %322 = arith.index_cast %311 : i32 to index
    %c0_125 = arith.constant 0 : index
    %c0_126 = arith.constant 0 : index
    %323 = vector.load %arg5[%322, %c0_125, %c0_126] : memref<64x8x8xf32, #tpu.memory_space<vmem>>, vector<1x8x8xf32>
    %324 = vector.shape_cast %323 : vector<1x8x8xf32> to vector<8x8xf32>
    %325 = arith.index_cast %315 : i32 to index
    %c0_127 = arith.constant 0 : index
    %c0_128 = arith.constant 0 : index
    %326 = vector.load %arg5[%325, %c0_127, %c0_128] : memref<64x8x8xf32, #tpu.memory_space<vmem>>, vector<1x8x8xf32>
    %327 = vector.shape_cast %326 : vector<1x8x8xf32> to vector<8x8xf32>
    %328 = vector.broadcast %315 : i32 to vector<8x8xi32>
    %329 = arith.cmpi eq, %13, %328 : vector<8x8xi32>
    %330 = vector.broadcast %311 : i32 to vector<8x8xi32>
    %331 = arith.cmpi eq, %13, %330 : vector<8x8xi32>
    %332 = arith.extui %329 : vector<8x8xi1> to vector<8x8xi32>
    %333 = arith.sitofp %332 : vector<8x8xi32> to vector<8x8xf32>
    %334 = arith.maximumf %318, %333 : vector<8x8xf32>
    %335 = arith.extui %331 : vector<8x8xi1> to vector<8x8xi32>
    %336 = arith.sitofp %335 : vector<8x8xi32> to vector<8x8xf32>
    %337 = arith.maximumf %321, %336 : vector<8x8xf32>
    %cst_129 = arith.constant 0.000000e+00 : f32
    %338 = vector.broadcast %cst_129 : f32 to vector<8x8xf32>
    %339 = arith.select %329, %338, %324 : vector<8x8xi1>, vector<8x8xf32>
    %340 = arith.addf %339, %334 : vector<8x8xf32>
    %cst_130 = arith.constant 0.000000e+00 : f32
    %341 = vector.broadcast %cst_130 : f32 to vector<8x8xf32>
    %342 = arith.select %331, %341, %327 : vector<8x8xi1>, vector<8x8xf32>
    %343 = arith.addf %342, %337 : vector<8x8xf32>
    %344 = vector.broadcast %0 : f32 to vector<8x8xf32>
    %345 = arith.cmpf ogt, %340, %344 : vector<8x8xf32>
    %cst_131 = arith.constant 0.000000e+00 : f32
    %346 = vector.broadcast %cst_131 : f32 to vector<8x8xf32>
    %347 = arith.select %345, %346, %334 : vector<8x8xi1>, vector<8x8xf32>
    %348 = vector.broadcast %0 : f32 to vector<8x8xf32>
    %349 = arith.cmpf ogt, %343, %348 : vector<8x8xf32>
    %cst_132 = arith.constant 0.000000e+00 : f32
    %350 = vector.broadcast %cst_132 : f32 to vector<8x8xf32>
    %351 = arith.select %349, %350, %337 : vector<8x8xi1>, vector<8x8xf32>
    %352 = arith.index_cast %311 : i32 to index
    %c0_133 = arith.constant 0 : index
    %c0_134 = arith.constant 0 : index
    %353 = vector.load %arg4[%352, %c0_133, %c0_134] : memref<64x8x8xf32, #tpu.memory_space<vmem>>, vector<1x8x8xf32>
    %354 = vector.shape_cast %353 : vector<1x8x8xf32> to vector<8x8xf32>
    %355 = vector.shape_cast %347 : vector<8x8xf32> to vector<1x8x8xf32>
    tpu.vector_store %arg4[%352, %c0_133, %c0_134], %355 {strides = array<i32>} : memref<64x8x8xf32, #tpu.memory_space<vmem>>, vector<1x8x8xf32>,
    %356 = arith.index_cast %315 : i32 to index
    %c0_135 = arith.constant 0 : index
    %c0_136 = arith.constant 0 : index
    %357 = vector.load %arg4[%356, %c0_135, %c0_136] : memref<64x8x8xf32, #tpu.memory_space<vmem>>, vector<1x8x8xf32>
    %358 = vector.shape_cast %357 : vector<1x8x8xf32> to vector<8x8xf32>
    %359 = vector.shape_cast %351 : vector<8x8xf32> to vector<1x8x8xf32>
    tpu.vector_store %arg4[%356, %c0_135, %c0_136], %359 {strides = array<i32>} : memref<64x8x8xf32, #tpu.memory_space<vmem>>, vector<1x8x8xf32>,
    %360 = arith.index_cast %311 : i32 to index
    %c0_137 = arith.constant 0 : index
    %c0_138 = arith.constant 0 : index
    %361 = vector.load %arg5[%360, %c0_137, %c0_138] : memref<64x8x8xf32, #tpu.memory_space<vmem>>, vector<1x8x8xf32>
    %362 = vector.shape_cast %361 : vector<1x8x8xf32> to vector<8x8xf32>
    %363 = vector.shape_cast %340 : vector<8x8xf32> to vector<1x8x8xf32>
    tpu.vector_store %arg5[%360, %c0_137, %c0_138], %363 {strides = array<i32>} : memref<64x8x8xf32, #tpu.memory_space<vmem>>, vector<1x8x8xf32>,
    %364 = arith.index_cast %315 : i32 to index
    %c0_139 = arith.constant 0 : index
    %c0_140 = arith.constant 0 : index
    %365 = vector.load %arg5[%364, %c0_139, %c0_140] : memref<64x8x8xf32, #tpu.memory_space<vmem>>, vector<1x8x8xf32>
    %366 = vector.shape_cast %365 : vector<1x8x8xf32> to vector<8x8xf32>
    %367 = vector.shape_cast %343 : vector<8x8xf32> to vector<1x8x8xf32>
    tpu.vector_store %arg5[%364, %c0_139, %c0_140], %367 {strides = array<i32>} : memref<64x8x8xf32, #tpu.memory_space<vmem>>, vector<1x8x8xf32>,
    %c6_i32 = arith.constant 6 : i32
    %c2_i32_141 = arith.constant 2 : i32
    %368 = arith.muli %c2_i32_141, %c6_i32 : i32
    %369 = arith.index_cast %368 : i32 to index
    %370 = memref.load %arg0[%369] : memref<16xi32, #tpu.memory_space<smem>>
    %c2_i32_142 = arith.constant 2 : i32
    %371 = arith.muli %c2_i32_142, %c6_i32 : i32
    %c1_i32_143 = arith.constant 1 : i32
    %372 = arith.addi %371, %c1_i32_143 : i32
    %373 = arith.index_cast %372 : i32 to index
    %374 = memref.load %arg0[%373] : memref<16xi32, #tpu.memory_space<smem>>
    %375 = arith.index_cast %370 : i32 to index
    %c0_144 = arith.constant 0 : index
    %c0_145 = arith.constant 0 : index
    %376 = vector.load %arg4[%375, %c0_144, %c0_145] : memref<64x8x8xf32, #tpu.memory_space<vmem>>, vector<1x8x8xf32>
    %377 = vector.shape_cast %376 : vector<1x8x8xf32> to vector<8x8xf32>
    %378 = arith.index_cast %374 : i32 to index
    %c0_146 = arith.constant 0 : index
    %c0_147 = arith.constant 0 : index
    %379 = vector.load %arg4[%378, %c0_146, %c0_147] : memref<64x8x8xf32, #tpu.memory_space<vmem>>, vector<1x8x8xf32>
    %380 = vector.shape_cast %379 : vector<1x8x8xf32> to vector<8x8xf32>
    %381 = arith.index_cast %370 : i32 to index
    %c0_148 = arith.constant 0 : index
    %c0_149 = arith.constant 0 : index
    %382 = vector.load %arg5[%381, %c0_148, %c0_149] : memref<64x8x8xf32, #tpu.memory_space<vmem>>, vector<1x8x8xf32>
    %383 = vector.shape_cast %382 : vector<1x8x8xf32> to vector<8x8xf32>
    %384 = arith.index_cast %374 : i32 to index
    %c0_150 = arith.constant 0 : index
    %c0_151 = arith.constant 0 : index
    %385 = vector.load %arg5[%384, %c0_150, %c0_151] : memref<64x8x8xf32, #tpu.memory_space<vmem>>, vector<1x8x8xf32>
    %386 = vector.shape_cast %385 : vector<1x8x8xf32> to vector<8x8xf32>
    %387 = vector.broadcast %374 : i32 to vector<8x8xi32>
    %388 = arith.cmpi eq, %13, %387 : vector<8x8xi32>
    %389 = vector.broadcast %370 : i32 to vector<8x8xi32>
    %390 = arith.cmpi eq, %13, %389 : vector<8x8xi32>
    %391 = arith.extui %388 : vector<8x8xi1> to vector<8x8xi32>
    %392 = arith.sitofp %391 : vector<8x8xi32> to vector<8x8xf32>
    %393 = arith.maximumf %377, %392 : vector<8x8xf32>
    %394 = arith.extui %390 : vector<8x8xi1> to vector<8x8xi32>
    %395 = arith.sitofp %394 : vector<8x8xi32> to vector<8x8xf32>
    %396 = arith.maximumf %380, %395 : vector<8x8xf32>
    %cst_152 = arith.constant 0.000000e+00 : f32
    %397 = vector.broadcast %cst_152 : f32 to vector<8x8xf32>
    %398 = arith.select %388, %397, %383 : vector<8x8xi1>, vector<8x8xf32>
    %399 = arith.addf %398, %393 : vector<8x8xf32>
    %cst_153 = arith.constant 0.000000e+00 : f32
    %400 = vector.broadcast %cst_153 : f32 to vector<8x8xf32>
    %401 = arith.select %390, %400, %386 : vector<8x8xi1>, vector<8x8xf32>
    %402 = arith.addf %401, %396 : vector<8x8xf32>
    %403 = vector.broadcast %0 : f32 to vector<8x8xf32>
    %404 = arith.cmpf ogt, %399, %403 : vector<8x8xf32>
    %cst_154 = arith.constant 0.000000e+00 : f32
    %405 = vector.broadcast %cst_154 : f32 to vector<8x8xf32>
    %406 = arith.select %404, %405, %393 : vector<8x8xi1>, vector<8x8xf32>
    %407 = vector.broadcast %0 : f32 to vector<8x8xf32>
    %408 = arith.cmpf ogt, %402, %407 : vector<8x8xf32>
    %cst_155 = arith.constant 0.000000e+00 : f32
    %409 = vector.broadcast %cst_155 : f32 to vector<8x8xf32>
    %410 = arith.select %408, %409, %396 : vector<8x8xi1>, vector<8x8xf32>
    %411 = arith.index_cast %370 : i32 to index
    %c0_156 = arith.constant 0 : index
    %c0_157 = arith.constant 0 : index
    %412 = vector.load %arg4[%411, %c0_156, %c0_157] : memref<64x8x8xf32, #tpu.memory_space<vmem>>, vector<1x8x8xf32>
    %413 = vector.shape_cast %412 : vector<1x8x8xf32> to vector<8x8xf32>
    %414 = vector.shape_cast %406 : vector<8x8xf32> to vector<1x8x8xf32>
    tpu.vector_store %arg4[%411, %c0_156, %c0_157], %414 {strides = array<i32>} : memref<64x8x8xf32, #tpu.memory_space<vmem>>, vector<1x8x8xf32>,
    %415 = arith.index_cast %374 : i32 to index
    %c0_158 = arith.constant 0 : index
    %c0_159 = arith.constant 0 : index
    %416 = vector.load %arg4[%415, %c0_158, %c0_159] : memref<64x8x8xf32, #tpu.memory_space<vmem>>, vector<1x8x8xf32>
    %417 = vector.shape_cast %416 : vector<1x8x8xf32> to vector<8x8xf32>
    %418 = vector.shape_cast %410 : vector<8x8xf32> to vector<1x8x8xf32>
    tpu.vector_store %arg4[%415, %c0_158, %c0_159], %418 {strides = array<i32>} : memref<64x8x8xf32, #tpu.memory_space<vmem>>, vector<1x8x8xf32>,
    %419 = arith.index_cast %370 : i32 to index
    %c0_160 = arith.constant 0 : index
    %c0_161 = arith.constant 0 : index
    %420 = vector.load %arg5[%419, %c0_160, %c0_161] : memref<64x8x8xf32, #tpu.memory_space<vmem>>, vector<1x8x8xf32>
    %421 = vector.shape_cast %420 : vector<1x8x8xf32> to vector<8x8xf32>
    %422 = vector.shape_cast %399 : vector<8x8xf32> to vector<1x8x8xf32>
    tpu.vector_store %arg5[%419, %c0_160, %c0_161], %422 {strides = array<i32>} : memref<64x8x8xf32, #tpu.memory_space<vmem>>, vector<1x8x8xf32>,
    %423 = arith.index_cast %374 : i32 to index
    %c0_162 = arith.constant 0 : index
    %c0_163 = arith.constant 0 : index
    %424 = vector.load %arg5[%423, %c0_162, %c0_163] : memref<64x8x8xf32, #tpu.memory_space<vmem>>, vector<1x8x8xf32>
    %425 = vector.shape_cast %424 : vector<1x8x8xf32> to vector<8x8xf32>
    %426 = vector.shape_cast %402 : vector<8x8xf32> to vector<1x8x8xf32>
    tpu.vector_store %arg5[%423, %c0_162, %c0_163], %426 {strides = array<i32>} : memref<64x8x8xf32, #tpu.memory_space<vmem>>, vector<1x8x8xf32>,
    %c7_i32 = arith.constant 7 : i32
    %c2_i32_164 = arith.constant 2 : i32
    %427 = arith.muli %c2_i32_164, %c7_i32 : i32
    %428 = arith.index_cast %427 : i32 to index
    %429 = memref.load %arg0[%428] : memref<16xi32, #tpu.memory_space<smem>>
    %c2_i32_165 = arith.constant 2 : i32
    %430 = arith.muli %c2_i32_165, %c7_i32 : i32
    %c1_i32_166 = arith.constant 1 : i32
    %431 = arith.addi %430, %c1_i32_166 : i32
    %432 = arith.index_cast %431 : i32 to index
    %433 = memref.load %arg0[%432] : memref<16xi32, #tpu.memory_space<smem>>
    %434 = arith.index_cast %429 : i32 to index
    %c0_167 = arith.constant 0 : index
    %c0_168 = arith.constant 0 : index
    %435 = vector.load %arg4[%434, %c0_167, %c0_168] : memref<64x8x8xf32, #tpu.memory_space<vmem>>, vector<1x8x8xf32>
    %436 = vector.shape_cast %435 : vector<1x8x8xf32> to vector<8x8xf32>
    %437 = arith.index_cast %433 : i32 to index
    %c0_169 = arith.constant 0 : index
    %c0_170 = arith.constant 0 : index
    %438 = vector.load %arg4[%437, %c0_169, %c0_170] : memref<64x8x8xf32, #tpu.memory_space<vmem>>, vector<1x8x8xf32>
    %439 = vector.shape_cast %438 : vector<1x8x8xf32> to vector<8x8xf32>
    %440 = arith.index_cast %429 : i32 to index
    %c0_171 = arith.constant 0 : index
    %c0_172 = arith.constant 0 : index
    %441 = vector.load %arg5[%440, %c0_171, %c0_172] : memref<64x8x8xf32, #tpu.memory_space<vmem>>, vector<1x8x8xf32>
    %442 = vector.shape_cast %441 : vector<1x8x8xf32> to vector<8x8xf32>
    %443 = arith.index_cast %433 : i32 to index
    %c0_173 = arith.constant 0 : index
    %c0_174 = arith.constant 0 : index
    %444 = vector.load %arg5[%443, %c0_173, %c0_174] : memref<64x8x8xf32, #tpu.memory_space<vmem>>, vector<1x8x8xf32>
    %445 = vector.shape_cast %444 : vector<1x8x8xf32> to vector<8x8xf32>
    %446 = vector.broadcast %433 : i32 to vector<8x8xi32>
    %447 = arith.cmpi eq, %13, %446 : vector<8x8xi32>
    %448 = vector.broadcast %429 : i32 to vector<8x8xi32>
    %449 = arith.cmpi eq, %13, %448 : vector<8x8xi32>
    %450 = arith.extui %447 : vector<8x8xi1> to vector<8x8xi32>
    %451 = arith.sitofp %450 : vector<8x8xi32> to vector<8x8xf32>
    %452 = arith.maximumf %436, %451 : vector<8x8xf32>
    %453 = arith.extui %449 : vector<8x8xi1> to vector<8x8xi32>
    %454 = arith.sitofp %453 : vector<8x8xi32> to vector<8x8xf32>
    %455 = arith.maximumf %439, %454 : vector<8x8xf32>
    %cst_175 = arith.constant 0.000000e+00 : f32
    %456 = vector.broadcast %cst_175 : f32 to vector<8x8xf32>
    %457 = arith.select %447, %456, %442 : vector<8x8xi1>, vector<8x8xf32>
    %458 = arith.addf %457, %452 : vector<8x8xf32>
    %cst_176 = arith.constant 0.000000e+00 : f32
    %459 = vector.broadcast %cst_176 : f32 to vector<8x8xf32>
    %460 = arith.select %449, %459, %445 : vector<8x8xi1>, vector<8x8xf32>
    %461 = arith.addf %460, %455 : vector<8x8xf32>
    %462 = vector.broadcast %0 : f32 to vector<8x8xf32>
    %463 = arith.cmpf ogt, %458, %462 : vector<8x8xf32>
    %cst_177 = arith.constant 0.000000e+00 : f32
    %464 = vector.broadcast %cst_177 : f32 to vector<8x8xf32>
    %465 = arith.select %463, %464, %452 : vector<8x8xi1>, vector<8x8xf32>
    %466 = vector.broadcast %0 : f32 to vector<8x8xf32>
    %467 = arith.cmpf ogt, %461, %466 : vector<8x8xf32>
    %cst_178 = arith.constant 0.000000e+00 : f32
    %468 = vector.broadcast %cst_178 : f32 to vector<8x8xf32>
    %469 = arith.select %467, %468, %455 : vector<8x8xi1>, vector<8x8xf32>
    %470 = arith.index_cast %429 : i32 to index
    %c0_179 = arith.constant 0 : index
    %c0_180 = arith.constant 0 : index
    %471 = vector.load %arg4[%470, %c0_179, %c0_180] : memref<64x8x8xf32, #tpu.memory_space<vmem>>, vector<1x8x8xf32>
    %472 = vector.shape_cast %471 : vector<1x8x8xf32> to vector<8x8xf32>
    %473 = vector.shape_cast %465 : vector<8x8xf32> to vector<1x8x8xf32>
    tpu.vector_store %arg4[%470, %c0_179, %c0_180], %473 {strides = array<i32>} : memref<64x8x8xf32, #tpu.memory_space<vmem>>, vector<1x8x8xf32>,
    %474 = arith.index_cast %433 : i32 to index
    %c0_181 = arith.constant 0 : index
    %c0_182 = arith.constant 0 : index
    %475 = vector.load %arg4[%474, %c0_181, %c0_182] : memref<64x8x8xf32, #tpu.memory_space<vmem>>, vector<1x8x8xf32>
    %476 = vector.shape_cast %475 : vector<1x8x8xf32> to vector<8x8xf32>
    %477 = vector.shape_cast %469 : vector<8x8xf32> to vector<1x8x8xf32>
    tpu.vector_store %arg4[%474, %c0_181, %c0_182], %477 {strides = array<i32>} : memref<64x8x8xf32, #tpu.memory_space<vmem>>, vector<1x8x8xf32>,
    %478 = arith.index_cast %429 : i32 to index
    %c0_183 = arith.constant 0 : index
    %c0_184 = arith.constant 0 : index
    %479 = vector.load %arg5[%478, %c0_183, %c0_184] : memref<64x8x8xf32, #tpu.memory_space<vmem>>, vector<1x8x8xf32>
    %480 = vector.shape_cast %479 : vector<1x8x8xf32> to vector<8x8xf32>
    %481 = vector.shape_cast %458 : vector<8x8xf32> to vector<1x8x8xf32>
    tpu.vector_store %arg5[%478, %c0_183, %c0_184], %481 {strides = array<i32>} : memref<64x8x8xf32, #tpu.memory_space<vmem>>, vector<1x8x8xf32>,
    %482 = arith.index_cast %433 : i32 to index
    %c0_185 = arith.constant 0 : index
    %c0_186 = arith.constant 0 : index
    %483 = vector.load %arg5[%482, %c0_185, %c0_186] : memref<64x8x8xf32, #tpu.memory_space<vmem>>, vector<1x8x8xf32>
    %484 = vector.shape_cast %483 : vector<1x8x8xf32> to vector<8x8xf32>
    %485 = vector.shape_cast %461 : vector<8x8xf32> to vector<1x8x8xf32>
    tpu.vector_store %arg5[%482, %c0_185, %c0_186], %485 {strides = array<i32>} : memref<64x8x8xf32, #tpu.memory_space<vmem>>, vector<1x8x8xf32>,
    %c8_i32_187 = arith.constant 8 : i32
    return
  }
}

</mosaic_0001>

<bundles_post_ra>
// kernel: neg.1
= control target key start
LH: loop header
LB: loop body
LE: loop exit
PB: predicated region body
PF: predicated region fallthrough
CT: control target
= control target key end

     0   :  { %2 = vsyncpa [#allocation1], 0  ;;  %s44_s6 = smov [#allocation0]   ;;  %s70_s0 = inlined_call_operand.hbm [shape: f32[8,64], index: 0, kind: input, shape index: {}]   ;;  %s71_s1 = inlined_call_operand.vmem [shape: f32[8,64], index: 1, kind: output, shape index: {}]  }
   0x1   :  { %s7_s7 = sshll.u32 %s44_s6, 4  ;;  %s20_s10 = scalar_lea.hbm %s70_s0, 128  ;;  %s8_s7 = int_to_ptr.vmem [resolvable:$true] %s7_s7 }
   0x2   :  { %p21_p0 = scmp.ne.s32.totalorder %s70_s0, %s20_s10  ;;  %p24_p1 = scmp.lt.u32.totalorder %s20_s10, %s70_s0 }
   0x4   :  { %p26_p2 = pnand %p24_p1, %p21_p0 }
   0x6   :  { %29 = shalt.err (!%p26_p2)
}
   0x7   :  { %s30_s15 = scalar_lea.vmem %s8_s7, 128  ;;  %p35_p4 = scmp.lt.s32.totalorder %s8_s7, %s8_s7 }
   0x8   :  { %p31_p3 = scmp.ne.s32.totalorder %s8_s7, %s30_s15  ;;  %p36_p5 = scmp.lt.s32.totalorder %s30_s15, %s30_s15 }
   0xa   :  { %p37_p6 = por %p36_p5, %p35_p4 }
   0xc   :  { %p38_p7 = pnand %p37_p6, %p31_p3 }
   0xe   :  { %41 = shalt.err (!%p38_p7)
}
   0xf   :  { %10 = dma.hbm_to_vmem [thread:$0]  %s70_s0, 128, %s8_s7, [#allocation1]  }
  0x10   :  { %42 = dma.done.wait [#allocation1], 128  }
  0x11   :  { %43 = vsyncadd [#allocation1], 4294967168  ;;  %v12_v0 = vld [vmem:[#allocation0] sm:$0xff] }
  0x12   :  { %v15_v1 = vxor.u32 2147483648, %v12_v0 }
  0x14   :  { %17 = vst [vmem:[%s71_s1] sm:$0xff] %v15_v1 }
  0x15   :  { %18 = vsyncpa [#allocation1], 1 }

// kernel: connection_topology_forward.1
= control target key start
LH: loop header
LB: loop body
LE: loop exit
PB: predicated region body
PF: predicated region fallthrough
CT: control target
= control target key end

     0   :  { %12 = vsyncpa [#allocation5], 0  ;;  %s2004_s0 = inlined_call_operand.vmem [shape: s32[16], index: 0, kind: input, shape index: {}]   ;;  %s2005_s1 = inlined_call_operand.<no memory space> [shape: f32[1], index: 1, kind: input, shape index: {}]   ;;  %s2006_s2 = inlined_call_operand.vmem [shape: f32[64,8,8], index: 2, kind: input, shape index: {}, may-alias: {2,4}]   ;;  %s2007_s3 = inlined_call_operand.vmem [shape: f32[64,8,8], index: 3, kind: input, shape index: {}, may-alias: {3,5}]   ;;  %s2008_s4 = inlined_call_operand.vmem [shape: f32[64,8,8], index: 4, kind: output, shape index: {0}, may-alias: {2,4}]   ;;  %s2009_s5 = inlined_call_operand.vmem [shape: f32[64,8,8], index: 5, kind: output, shape index: {1}, may-alias: {3,5}]  }
   0x1   :  { %s19_s20 = sshll.u32 %s2004_s0, 4  ;;  %s20_s20 = int_to_ptr.vmem [resolvable:$true] %s19_s20 }
   0x2   :  { %s806_s21 = scalar_lea.vmem %s20_s20, 16  ;;  %p811_p1 = scmp.lt.s32.totalorder %s20_s20, %s20_s20 }
   0x3   :  { %p807_p0 = scmp.ne.s32.totalorder %s20_s20, %s806_s21  ;;  %p812_p2 = scmp.lt.s32.totalorder %s806_s21, %s806_s21 }
   0x5   :  { %p813_p3 = por %p812_p2, %p811_p1 }
   0x7   :  { %p814_p4 = pnand %p813_p3, %p807_p0 }
   0x9   :  { %817 = shalt.err (!%p814_p4)
}
   0xa   :  { %s824_s22 = smov [#allocation4]  }
   0xb   :  { %22 = dma.vmem_to_smem %s20_s20, 16, %s824_s22, [#allocation5]  }
   0xc   :  { %818 = dma.done.wait [#allocation5], 16  }
   0xd   :  { %819 = vsyncadd [#allocation5], 4294967280 }
   0xe   :  { %28 = sfence }
   0xf   :  { %v62_v0 = vld [vmem:[%s2006_s2] sm:$0xff]  ;;  %v64_v1 = vld [vmem:[%s2006_s2 + $0x8] sm:$0xff]  ;;  %v66_v2 = vld [vmem:[%s2006_s2 + $0x10] sm:$0xff] }
  0x10   :  { %63 = vst [vmem:[%s2008_s4] sm:$0xff] %v62_v0  ;;  %65 = vst [vmem:[%s2008_s4 + $0x8] sm:$0xff] %v64_v1 }
  0x11   :  { %67 = vst [vmem:[%s2008_s4 + $0x10] sm:$0xff] %v66_v2 }
  0x18   :  { %v68_v3 = vld [vmem:[%s2006_s2 + $0x18] sm:$0xff]  ;;  %v70_v4 = vld [vmem:[%s2006_s2 + $0x20] sm:$0xff]  ;;  %v72_v5 = vld [vmem:[%s2006_s2 + $0x28] sm:$0xff] }
  0x19   :  { %69 = vst [vmem:[%s2008_s4 + $0x18] sm:$0xff] %v68_v3  ;;  %71 = vst [vmem:[%s2008_s4 + $0x20] sm:$0xff] %v70_v4 }
  0x1a   :  { %73 = vst [vmem:[%s2008_s4 + $0x28] sm:$0xff] %v72_v5 }
  0x21   :  { %v74_v6 = vld [vmem:[%s2006_s2 + $0x30] sm:$0xff]  ;;  %v76_v7 = vld [vmem:[%s2006_s2 + $0x38] sm:$0xff]  ;;  %v78_v8 = vld [vmem:[%s2006_s2 + $0x40] sm:$0xff] }
  0x22   :  { %75 = vst [vmem:[%s2008_s4 + $0x30] sm:$0xff] %v74_v6  ;;  %77 = vst [vmem:[%s2008_s4 + $0x38] sm:$0xff] %v76_v7 }
  0x23   :  { %79 = vst [vmem:[%s2008_s4 + $0x40] sm:$0xff] %v78_v8 }
  0x2a   :  { %v80_v9 = vld [vmem:[%s2006_s2 + $0x48] sm:$0xff]  ;;  %v82_v10 = vld [vmem:[%s2006_s2 + $0x50] sm:$0xff]  ;;  %v84_v11 = vld [vmem:[%s2006_s2 + $0x58] sm:$0xff] }
  0x2b   :  { %81 = vst [vmem:[%s2008_s4 + $0x48] sm:$0xff] %v80_v9  ;;  %83 = vst [vmem:[%s2008_s4 + $0x50] sm:$0xff] %v82_v10 }
  0x2c   :  { %85 = vst [vmem:[%s2008_s4 + $0x58] sm:$0xff] %v84_v11 }
  0x33   :  { %v86_v12 = vld [vmem:[%s2006_s2 + $0x60] sm:$0xff]  ;;  %v88_v13 = vld [vmem:[%s2006_s2 + $0x68] sm:$0xff]  ;;  %v90_v14 = vld [vmem:[%s2006_s2 + $0x70] sm:$0xff] }
  0x34   :  { %87 = vst [vmem:[%s2008_s4 + $0x60] sm:$0xff] %v86_v12  ;;  %89 = vst [vmem:[%s2008_s4 + $0x68] sm:$0xff] %v88_v13 }
  0x35   :  { %91 = vst [vmem:[%s2008_s4 + $0x70] sm:$0xff] %v90_v14 }
  0x3c   :  { %v92_v15 = vld [vmem:[%s2006_s2 + $0x78] sm:$0xff]  ;;  %v94_v16 = vld [vmem:[%s2006_s2 + $0x80] sm:$0xff]  ;;  %v96_v17 = vld [vmem:[%s2006_s2 + $0x88] sm:$0xff] }
  0x3d   :  { %93 = vst [vmem:[%s2008_s4 + $0x78] sm:$0xff] %v92_v15  ;;  %95 = vst [vmem:[%s2008_s4 + $0x80] sm:$0xff] %v94_v16 }
  0x3e   :  { %97 = vst [vmem:[%s2008_s4 + $0x88] sm:$0xff] %v96_v17 }
  0x45   :  { %v98_v18 = vld [vmem:[%s2006_s2 + $0x90] sm:$0xff]  ;;  %v100_v19 = vld [vmem:[%s2006_s2 + $0x98] sm:$0xff]  ;;  %v102_v20 = vld [vmem:[%s2006_s2 + $0xa0] sm:$0xff] }
  0x46   :  { %99 = vst [vmem:[%s2008_s4 + $0x90] sm:$0xff] %v98_v18  ;;  %101 = vst [vmem:[%s2008_s4 + $0x98] sm:$0xff] %v100_v19 }
  0x47   :  { %103 = vst [vmem:[%s2008_s4 + $0xa0] sm:$0xff] %v102_v20 }
  0x4e   :  { %v104_v21 = vld [vmem:[%s2006_s2 + $0xa8] sm:$0xff]  ;;  %v106_v22 = vld [vmem:[%s2006_s2 + $0xb0] sm:$0xff]  ;;  %v108_v23 = vld [vmem:[%s2006_s2 + $0xb8] sm:$0xff] }
  0x4f   :  { %105 = vst [vmem:[%s2008_s4 + $0xa8] sm:$0xff] %v104_v21  ;;  %107 = vst [vmem:[%s2008_s4 + $0xb0] sm:$0xff] %v106_v22 }
  0x50   :  { %109 = vst [vmem:[%s2008_s4 + $0xb8] sm:$0xff] %v108_v23 }
  0x57   :  { %v110_v24 = vld [vmem:[%s2006_s2 + $0xc0] sm:$0xff]  ;;  %v112_v25 = vld [vmem:[%s2006_s2 + $0xc8] sm:$0xff]  ;;  %v114_v26 = vld [vmem:[%s2006_s2 + $0xd0] sm:$0xff] }
  0x58   :  { %111 = vst [vmem:[%s2008_s4 + $0xc0] sm:$0xff] %v110_v24  ;;  %113 = vst [vmem:[%s2008_s4 + $0xc8] sm:$0xff] %v112_v25 }
  0x59   :  { %115 = vst [vmem:[%s2008_s4 + $0xd0] sm:$0xff] %v114_v26 }
  0x60   :  { %v116_v27 = vld [vmem:[%s2006_s2 + $0xd8] sm:$0xff]  ;;  %v118_v28 = vld [vmem:[%s2006_s2 + $0xe0] sm:$0xff]  ;;  %v120_v29 = vld [vmem:[%s2006_s2 + $0xe8] sm:$0xff] }
  0x61   :  { %117 = vst [vmem:[%s2008_s4 + $0xd8] sm:$0xff] %v116_v27  ;;  %119 = vst [vmem:[%s2008_s4 + $0xe0] sm:$0xff] %v118_v28 }
  0x62   :  { %121 = vst [vmem:[%s2008_s4 + $0xe8] sm:$0xff] %v120_v29 }
  0x69   :  { %v122_v30 = vld [vmem:[%s2006_s2 + $0xf0] sm:$0xff]  ;;  %v124_v31 = vld [vmem:[%s2006_s2 + $0xf8] sm:$0xff]  ;;  %v126_v32 = vld [vmem:[%s2006_s2 + $0x100] sm:$0xff] }
  0x6a   :  { %123 = vst [vmem:[%s2008_s4 + $0xf0] sm:$0xff] %v122_v30  ;;  %125 = vst [vmem:[%s2008_s4 + $0xf8] sm:$0xff] %v124_v31 }
  0x6b   :  { %127 = vst [vmem:[%s2008_s4 + $0x100] sm:$0xff] %v126_v32 }
  0x72   :  { %v128_v33 = vld [vmem:[%s2006_s2 + $0x108] sm:$0xff]  ;;  %v130_v34 = vld [vmem:[%s2006_s2 + $0x110] sm:$0xff]  ;;  %v132_v35 = vld [vmem:[%s2006_s2 + $0x118] sm:$0xff] }
  0x73   :  { %129 = vst [vmem:[%s2008_s4 + $0x108] sm:$0xff] %v128_v33  ;;  %131 = vst [vmem:[%s2008_s4 + $0x110] sm:$0xff] %v130_v34 }
  0x74   :  { %133 = vst [vmem:[%s2008_s4 + $0x118] sm:$0xff] %v132_v35 }
  0x7b   :  { %v134_v36 = vld [vmem:[%s2006_s2 + $0x120] sm:$0xff]  ;;  %v136_v37 = vld [vmem:[%s2006_s2 + $0x128] sm:$0xff]  ;;  %v138_v38 = vld [vmem:[%s2006_s2 + $0x130] sm:$0xff] }
  0x7c   :  { %135 = vst [vmem:[%s2008_s4 + $0x120] sm:$0xff] %v134_v36  ;;  %137 = vst [vmem:[%s2008_s4 + $0x128] sm:$0xff] %v136_v37 }
  0x7d   :  { %139 = vst [vmem:[%s2008_s4 + $0x130] sm:$0xff] %v138_v38 }
  0x84   :  { %v140_v39 = vld [vmem:[%s2006_s2 + $0x138] sm:$0xff]  ;;  %v142_v40 = vld [vmem:[%s2006_s2 + $0x140] sm:$0xff]  ;;  %v144_v41 = vld [vmem:[%s2006_s2 + $0x148] sm:$0xff] }
  0x85   :  { %141 = vst [vmem:[%s2008_s4 + $0x138] sm:$0xff] %v140_v39  ;;  %143 = vst [vmem:[%s2008_s4 + $0x140] sm:$0xff] %v142_v40 }
  0x86   :  { %145 = vst [vmem:[%s2008_s4 + $0x148] sm:$0xff] %v144_v41 }
  0x8d   :  { %v146_v42 = vld [vmem:[%s2006_s2 + $0x150] sm:$0xff]  ;;  %v148_v43 = vld [vmem:[%s2006_s2 + $0x158] sm:$0xff]  ;;  %v150_v44 = vld [vmem:[%s2006_s2 + $0x160] sm:$0xff] }
  0x8e   :  { %147 = vst [vmem:[%s2008_s4 + $0x150] sm:$0xff] %v146_v42  ;;  %149 = vst [vmem:[%s2008_s4 + $0x158] sm:$0xff] %v148_v43 }
  0x8f   :  { %151 = vst [vmem:[%s2008_s4 + $0x160] sm:$0xff] %v150_v44 }
  0x96   :  { %v152_v45 = vld [vmem:[%s2006_s2 + $0x168] sm:$0xff]  ;;  %v154_v46 = vld [vmem:[%s2006_s2 + $0x170] sm:$0xff]  ;;  %v156_v47 = vld [vmem:[%s2006_s2 + $0x178] sm:$0xff] }
  0x97   :  { %153 = vst [vmem:[%s2008_s4 + $0x168] sm:$0xff] %v152_v45  ;;  %155 = vst [vmem:[%s2008_s4 + $0x170] sm:$0xff] %v154_v46 }
  0x98   :  { %157 = vst [vmem:[%s2008_s4 + $0x178] sm:$0xff] %v156_v47 }
  0x9f   :  { %v158_v48 = vld [vmem:[%s2006_s2 + $0x180] sm:$0xff]  ;;  %v160_v49 = vld [vmem:[%s2006_s2 + $0x188] sm:$0xff]  ;;  %v162_v50 = vld [vmem:[%s2006_s2 + $0x190] sm:$0xff] }
  0xa0   :  { %159 = vst [vmem:[%s2008_s4 + $0x180] sm:$0xff] %v158_v48  ;;  %161 = vst [vmem:[%s2008_s4 + $0x188] sm:$0xff] %v160_v49 }
  0xa1   :  { %163 = vst [vmem:[%s2008_s4 + $0x190] sm:$0xff] %v162_v50 }
  0xa8   :  { %v164_v51 = vld [vmem:[%s2006_s2 + $0x198] sm:$0xff]  ;;  %v166_v52 = vld [vmem:[%s2006_s2 + $0x1a0] sm:$0xff]  ;;  %v168_v53 = vld [vmem:[%s2006_s2 + $0x1a8] sm:$0xff] }
  0xa9   :  { %165 = vst [vmem:[%s2008_s4 + $0x198] sm:$0xff] %v164_v51  ;;  %167 = vst [vmem:[%s2008_s4 + $0x1a0] sm:$0xff] %v166_v52 }
  0xaa   :  { %169 = vst [vmem:[%s2008_s4 + $0x1a8] sm:$0xff] %v168_v53 }
  0xb1   :  { %v170_v54 = vld [vmem:[%s2006_s2 + $0x1b0] sm:$0xff]  ;;  %v172_v55 = vld [vmem:[%s2006_s2 + $0x1b8] sm:$0xff]  ;;  %v174_v56 = vld [vmem:[%s2006_s2 + $0x1c0] sm:$0xff] }
  0xb2   :  { %171 = vst [vmem:[%s2008_s4 + $0x1b0] sm:$0xff] %v170_v54  ;;  %173 = vst [vmem:[%s2008_s4 + $0x1b8] sm:$0xff] %v172_v55 }
  0xb3   :  { %175 = vst [vmem:[%s2008_s4 + $0x1c0] sm:$0xff] %v174_v56 }
  0xba   :  { %v176_v57 = vld [vmem:[%s2006_s2 + $0x1c8] sm:$0xff]  ;;  %v178_v58 = vld [vmem:[%s2006_s2 + $0x1d0] sm:$0xff]  ;;  %v180_v59 = vld [vmem:[%s2006_s2 + $0x1d8] sm:$0xff] }
  0xbb   :  { %177 = vst [vmem:[%s2008_s4 + $0x1c8] sm:$0xff] %v176_v57  ;;  %179 = vst [vmem:[%s2008_s4 + $0x1d0] sm:$0xff] %v178_v58 }
  0xbc   :  { %181 = vst [vmem:[%s2008_s4 + $0x1d8] sm:$0xff] %v180_v59 }
  0xc3   :  { %v182_v60 = vld [vmem:[%s2006_s2 + $0x1e0] sm:$0xff]  ;;  %v184_v61 = vld [vmem:[%s2006_s2 + $0x1e8] sm:$0xff]  ;;  %v186_v62 = vld [vmem:[%s2006_s2 + $0x1f0] sm:$0xff] }
  0xc4   :  { %183 = vst [vmem:[%s2008_s4 + $0x1e0] sm:$0xff] %v182_v60  ;;  %185 = vst [vmem:[%s2008_s4 + $0x1e8] sm:$0xff] %v184_v61 }
  0xc5   :  { %187 = vst [vmem:[%s2008_s4 + $0x1f0] sm:$0xff] %v186_v62 }
  0xcc   :  { %v188_v63 = vld [vmem:[%s2006_s2 + $0x1f8] sm:$0xff] }
  0xcd   :  { %189 = vst [vmem:[%s2008_s4 + $0x1f8] sm:$0xff] %v188_v63 }
  0xce   :  { %197 = vsyncadd [#allocation2], 8192  ;;  %v231_v0 = vld [vmem:[%s2007_s3] sm:$0xff]  ;;  %v233_v1 = vld [vmem:[%s2007_s3 + $0x8] sm:$0xff] }
  0xcf   :  { %232 = vst [vmem:[%s2009_s5] sm:$0xff] %v231_v0  ;;  %234 = vst [vmem:[%s2009_s5 + $0x8] sm:$0xff] %v233_v1 }
  0xd6   :  { %v235_v2 = vld [vmem:[%s2007_s3 + $0x10] sm:$0xff]  ;;  %v237_v3 = vld [vmem:[%s2007_s3 + $0x18] sm:$0xff]  ;;  %v239_v4 = vld [vmem:[%s2007_s3 + $0x20] sm:$0xff] }
  0xd7   :  { %236 = vst [vmem:[%s2009_s5 + $0x10] sm:$0xff] %v235_v2  ;;  %238 = vst [vmem:[%s2009_s5 + $0x18] sm:$0xff] %v237_v3 }
  0xd8   :  { %240 = vst [vmem:[%s2009_s5 + $0x20] sm:$0xff] %v239_v4 }
  0xdf   :  { %v241_v5 = vld [vmem:[%s2007_s3 + $0x28] sm:$0xff]  ;;  %v243_v6 = vld [vmem:[%s2007_s3 + $0x30] sm:$0xff]  ;;  %v245_v7 = vld [vmem:[%s2007_s3 + $0x38] sm:$0xff] }
  0xe0   :  { %242 = vst [vmem:[%s2009_s5 + $0x28] sm:$0xff] %v241_v5  ;;  %244 = vst [vmem:[%s2009_s5 + $0x30] sm:$0xff] %v243_v6 }
  0xe1   :  { %246 = vst [vmem:[%s2009_s5 + $0x38] sm:$0xff] %v245_v7 }
  0xe8   :  { %v247_v8 = vld [vmem:[%s2007_s3 + $0x40] sm:$0xff]  ;;  %v249_v9 = vld [vmem:[%s2007_s3 + $0x48] sm:$0xff]  ;;  %v251_v10 = vld [vmem:[%s2007_s3 + $0x50] sm:$0xff] }
  0xe9   :  { %248 = vst [vmem:[%s2009_s5 + $0x40] sm:$0xff] %v247_v8  ;;  %250 = vst [vmem:[%s2009_s5 + $0x48] sm:$0xff] %v249_v9 }
  0xea   :  { %252 = vst [vmem:[%s2009_s5 + $0x50] sm:$0xff] %v251_v10 }
  0xf1   :  { %v253_v11 = vld [vmem:[%s2007_s3 + $0x58] sm:$0xff]  ;;  %v255_v12 = vld [vmem:[%s2007_s3 + $0x60] sm:$0xff]  ;;  %v257_v13 = vld [vmem:[%s2007_s3 + $0x68] sm:$0xff] }
  0xf2   :  { %254 = vst [vmem:[%s2009_s5 + $0x58] sm:$0xff] %v253_v11  ;;  %256 = vst [vmem:[%s2009_s5 + $0x60] sm:$0xff] %v255_v12 }
  0xf3   :  { %258 = vst [vmem:[%s2009_s5 + $0x68] sm:$0xff] %v257_v13 }
  0xfa   :  { %v259_v14 = vld [vmem:[%s2007_s3 + $0x70] sm:$0xff]  ;;  %v261_v15 = vld [vmem:[%s2007_s3 + $0x78] sm:$0xff]  ;;  %v263_v16 = vld [vmem:[%s2007_s3 + $0x80] sm:$0xff] }
  0xfb   :  { %260 = vst [vmem:[%s2009_s5 + $0x70] sm:$0xff] %v259_v14  ;;  %262 = vst [vmem:[%s2009_s5 + $0x78] sm:$0xff] %v261_v15 }
  0xfc   :  { %264 = vst [vmem:[%s2009_s5 + $0x80] sm:$0xff] %v263_v16 }
 0x103   :  { %v265_v17 = vld [vmem:[%s2007_s3 + $0x88] sm:$0xff]  ;;  %v267_v18 = vld [vmem:[%s2007_s3 + $0x90] sm:$0xff]  ;;  %v269_v19 = vld [vmem:[%s2007_s3 + $0x98] sm:$0xff] }
 0x104   :  { %266 = vst [vmem:[%s2009_s5 + $0x88] sm:$0xff] %v265_v17  ;;  %268 = vst [vmem:[%s2009_s5 + $0x90] sm:$0xff] %v267_v18 }
 0x105   :  { %270 = vst [vmem:[%s2009_s5 + $0x98] sm:$0xff] %v269_v19 }
 0x10c   :  { %v271_v20 = vld [vmem:[%s2007_s3 + $0xa0] sm:$0xff]  ;;  %v273_v21 = vld [vmem:[%s2007_s3 + $0xa8] sm:$0xff]  ;;  %v275_v22 = vld [vmem:[%s2007_s3 + $0xb0] sm:$0xff] }
 0x10d   :  { %272 = vst [vmem:[%s2009_s5 + $0xa0] sm:$0xff] %v271_v20  ;;  %274 = vst [vmem:[%s2009_s5 + $0xa8] sm:$0xff] %v273_v21 }
 0x10e   :  { %276 = vst [vmem:[%s2009_s5 + $0xb0] sm:$0xff] %v275_v22 }
 0x115   :  { %v277_v23 = vld [vmem:[%s2007_s3 + $0xb8] sm:$0xff]  ;;  %v279_v24 = vld [vmem:[%s2007_s3 + $0xc0] sm:$0xff]  ;;  %v281_v25 = vld [vmem:[%s2007_s3 + $0xc8] sm:$0xff] }
 0x116   :  { %278 = vst [vmem:[%s2009_s5 + $0xb8] sm:$0xff] %v277_v23  ;;  %280 = vst [vmem:[%s2009_s5 + $0xc0] sm:$0xff] %v279_v24 }
 0x117   :  { %282 = vst [vmem:[%s2009_s5 + $0xc8] sm:$0xff] %v281_v25 }
 0x11e   :  { %v283_v26 = vld [vmem:[%s2007_s3 + $0xd0] sm:$0xff]  ;;  %v285_v27 = vld [vmem:[%s2007_s3 + $0xd8] sm:$0xff]  ;;  %v287_v28 = vld [vmem:[%s2007_s3 + $0xe0] sm:$0xff] }
 0x11f   :  { %284 = vst [vmem:[%s2009_s5 + $0xd0] sm:$0xff] %v283_v26  ;;  %286 = vst [vmem:[%s2009_s5 + $0xd8] sm:$0xff] %v285_v27 }
 0x120   :  { %288 = vst [vmem:[%s2009_s5 + $0xe0] sm:$0xff] %v287_v28 }
 0x127   :  { %v289_v29 = vld [vmem:[%s2007_s3 + $0xe8] sm:$0xff]  ;;  %v291_v30 = vld [vmem:[%s2007_s3 + $0xf0] sm:$0xff]  ;;  %v293_v31 = vld [vmem:[%s2007_s3 + $0xf8] sm:$0xff] }
 0x128   :  { %290 = vst [vmem:[%s2009_s5 + $0xe8] sm:$0xff] %v289_v29  ;;  %292 = vst [vmem:[%s2009_s5 + $0xf0] sm:$0xff] %v291_v30 }
 0x129   :  { %294 = vst [vmem:[%s2009_s5 + $0xf8] sm:$0xff] %v293_v31 }
 0x130   :  { %v295_v32 = vld [vmem:[%s2007_s3 + $0x100] sm:$0xff]  ;;  %v297_v33 = vld [vmem:[%s2007_s3 + $0x108] sm:$0xff]  ;;  %v299_v34 = vld [vmem:[%s2007_s3 + $0x110] sm:$0xff] }
 0x131   :  { %296 = vst [vmem:[%s2009_s5 + $0x100] sm:$0xff] %v295_v32  ;;  %298 = vst [vmem:[%s2009_s5 + $0x108] sm:$0xff] %v297_v33 }
 0x132   :  { %300 = vst [vmem:[%s2009_s5 + $0x110] sm:$0xff] %v299_v34 }
 0x139   :  { %v301_v35 = vld [vmem:[%s2007_s3 + $0x118] sm:$0xff]  ;;  %v303_v36 = vld [vmem:[%s2007_s3 + $0x120] sm:$0xff]  ;;  %v305_v37 = vld [vmem:[%s2007_s3 + $0x128] sm:$0xff] }
 0x13a   :  { %302 = vst [vmem:[%s2009_s5 + $0x118] sm:$0xff] %v301_v35  ;;  %304 = vst [vmem:[%s2009_s5 + $0x120] sm:$0xff] %v303_v36 }
 0x13b   :  { %306 = vst [vmem:[%s2009_s5 + $0x128] sm:$0xff] %v305_v37 }
 0x142   :  { %v307_v38 = vld [vmem:[%s2007_s3 + $0x130] sm:$0xff]  ;;  %v309_v39 = vld [vmem:[%s2007_s3 + $0x138] sm:$0xff]  ;;  %v311_v40 = vld [vmem:[%s2007_s3 + $0x140] sm:$0xff] }
 0x143   :  { %308 = vst [vmem:[%s2009_s5 + $0x130] sm:$0xff] %v307_v38  ;;  %310 = vst [vmem:[%s2009_s5 + $0x138] sm:$0xff] %v309_v39 }
 0x144   :  { %312 = vst [vmem:[%s2009_s5 + $0x140] sm:$0xff] %v311_v40 }
 0x14b   :  { %v313_v41 = vld [vmem:[%s2007_s3 + $0x148] sm:$0xff]  ;;  %v315_v42 = vld [vmem:[%s2007_s3 + $0x150] sm:$0xff]  ;;  %v317_v43 = vld [vmem:[%s2007_s3 + $0x158] sm:$0xff] }
 0x14c   :  { %314 = vst [vmem:[%s2009_s5 + $0x148] sm:$0xff] %v313_v41  ;;  %316 = vst [vmem:[%s2009_s5 + $0x150] sm:$0xff] %v315_v42 }
 0x14d   :  { %318 = vst [vmem:[%s2009_s5 + $0x158] sm:$0xff] %v317_v43 }
 0x154   :  { %v319_v44 = vld [vmem:[%s2007_s3 + $0x160] sm:$0xff]  ;;  %v321_v45 = vld [vmem:[%s2007_s3 + $0x168] sm:$0xff]  ;;  %v323_v46 = vld [vmem:[%s2007_s3 + $0x170] sm:$0xff] }
 0x155   :  { %320 = vst [vmem:[%s2009_s5 + $0x160] sm:$0xff] %v319_v44  ;;  %322 = vst [vmem:[%s2009_s5 + $0x168] sm:$0xff] %v321_v45 }
 0x156   :  { %324 = vst [vmem:[%s2009_s5 + $0x170] sm:$0xff] %v323_v46 }
 0x15d   :  { %v325_v47 = vld [vmem:[%s2007_s3 + $0x178] sm:$0xff]  ;;  %v327_v48 = vld [vmem:[%s2007_s3 + $0x180] sm:$0xff]  ;;  %v329_v49 = vld [vmem:[%s2007_s3 + $0x188] sm:$0xff] }
 0x15e   :  { %326 = vst [vmem:[%s2009_s5 + $0x178] sm:$0xff] %v325_v47  ;;  %328 = vst [vmem:[%s2009_s5 + $0x180] sm:$0xff] %v327_v48 }
 0x15f   :  { %330 = vst [vmem:[%s2009_s5 + $0x188] sm:$0xff] %v329_v49 }
 0x166   :  { %v331_v50 = vld [vmem:[%s2007_s3 + $0x190] sm:$0xff]  ;;  %v333_v51 = vld [vmem:[%s2007_s3 + $0x198] sm:$0xff]  ;;  %v335_v52 = vld [vmem:[%s2007_s3 + $0x1a0] sm:$0xff] }
 0x167   :  { %332 = vst [vmem:[%s2009_s5 + $0x190] sm:$0xff] %v331_v50  ;;  %334 = vst [vmem:[%s2009_s5 + $0x198] sm:$0xff] %v333_v51 }
 0x168   :  { %336 = vst [vmem:[%s2009_s5 + $0x1a0] sm:$0xff] %v335_v52 }
 0x16f   :  { %v337_v53 = vld [vmem:[%s2007_s3 + $0x1a8] sm:$0xff]  ;;  %v339_v54 = vld [vmem:[%s2007_s3 + $0x1b0] sm:$0xff]  ;;  %v341_v55 = vld [vmem:[%s2007_s3 + $0x1b8] sm:$0xff] }
 0x170   :  { %338 = vst [vmem:[%s2009_s5 + $0x1a8] sm:$0xff] %v337_v53  ;;  %340 = vst [vmem:[%s2009_s5 + $0x1b0] sm:$0xff] %v339_v54 }
 0x171   :  { %342 = vst [vmem:[%s2009_s5 + $0x1b8] sm:$0xff] %v341_v55 }
 0x178   :  { %v343_v56 = vld [vmem:[%s2007_s3 + $0x1c0] sm:$0xff]  ;;  %v345_v57 = vld [vmem:[%s2007_s3 + $0x1c8] sm:$0xff]  ;;  %v347_v58 = vld [vmem:[%s2007_s3 + $0x1d0] sm:$0xff] }
 0x179   :  { %344 = vst [vmem:[%s2009_s5 + $0x1c0] sm:$0xff] %v343_v56  ;;  %346 = vst [vmem:[%s2009_s5 + $0x1c8] sm:$0xff] %v345_v57 }
 0x17a   :  { %348 = vst [vmem:[%s2009_s5 + $0x1d0] sm:$0xff] %v347_v58 }
 0x181   :  { %v349_v59 = vld [vmem:[%s2007_s3 + $0x1d8] sm:$0xff]  ;;  %v351_v60 = vld [vmem:[%s2007_s3 + $0x1e0] sm:$0xff]  ;;  %v353_v61 = vld [vmem:[%s2007_s3 + $0x1e8] sm:$0xff] }
 0x182   :  { %350 = vst [vmem:[%s2009_s5 + $0x1d8] sm:$0xff] %v349_v59  ;;  %352 = vst [vmem:[%s2009_s5 + $0x1e0] sm:$0xff] %v351_v60 }
 0x183   :  { %354 = vst [vmem:[%s2009_s5 + $0x1e8] sm:$0xff] %v353_v61 }
 0x18a   :  { %v355_v62 = vld [vmem:[%s2007_s3 + $0x1f0] sm:$0xff]  ;;  %v357_v63 = vld [vmem:[%s2007_s3 + $0x1f8] sm:$0xff] }
 0x18b   :  { %356 = vst [vmem:[%s2009_s5 + $0x1f0] sm:$0xff] %v355_v62  ;;  %358 = vst [vmem:[%s2009_s5 + $0x1f8] sm:$0xff] %v357_v63 }
 0x18c   :  { %366 = vsyncadd [#allocation2 + $0x1], 8192 }
 0x18d   :  { %820 = dma.done.wait [#allocation2], 8192 }
 0x18e   :  { %821 = vsyncadd [#allocation2], 4294959104 }
 0x18f   :  { %822 = dma.done.wait [#allocation2 + $0x1], 8192 }
 0x190   :  { %823 = vsyncadd [#allocation2 + $0x1], 4294959104  ;;  %v373_v0 = vlaneseq  ;;  %s379_s30 = sld [smem:[#allocation4]]  ;;  %s755_s6 = sld [smem:[#allocation4 + $0x1]]  ;;  %v825_v11 = vmov 0.0   ;;  %v1673_v19 = vstv %s2005_s1  ;;  %vm410_vm2 = vcmask 64512  }
 0x191   :  { %s1627_s3 = sld [smem:[#allocation4 + $0x2]]  ;;  %s1629_s7 = sld [smem:[#allocation4 + $0x3]] }
 0x192   :  { %v374_v1 = vshrl.u32 %v373_v0, 7  ;;  %v376_v2 = vand.u32 127, %v373_v0  ;;  %s1633_s8 = sld [smem:[#allocation4 + $0xa]]  ;;  %s1635_s9 = sld [smem:[#allocation4 + $0xb]] }
 0x193   :  { %s1740_s13 = sld [smem:[#allocation4 + $0x5]]  ;;  %s1749_s15 = sld [smem:[#allocation4 + $0xc]] }
 0x194   :  { %v377_v3 = vmul.u32 8, %v374_v1  ;;  %s1751_s16 = sld [smem:[#allocation4 + $0xd]]  ;;  %s1755_s18 = sld [smem:[#allocation4 + $0xf]] }
 0x196   :  { %v1631_v4 = vadd.s32 %v377_v3, %v376_v2  ;;  %s756_s10 = sshll.u32 %s379_s30, 3  ;;  %s757_s11 = sshll.u32 %s755_s6, 3  ;;  %v391_v5 = vstv %s755_s6  ;;  %v393_v6 = vstv %s379_s30 }
 0x197   :  { %s382_s14 = scalar_lea.vmem %s2008_s4, %s756_s10  ;;  %s1643_s17 = scalar_lea.vmem %s2008_s4, %s757_s11  ;;  %v427_v25 = vstv %s1629_s7  ;;  %v429_v26 = vstv %s1627_s3 }
 0x198   :  { %vm1646_vm0 = vcmp.eq.s32.totalorder %v1631_v4, %v391_v5  ;;  %vm1651_vm1 = vcmp.eq.s32.totalorder %v1631_v4, %v393_v6  ;;  %v383_v9 = vld [vmem:[%s382_s14] sm:$0xff]  ;;  %s387_s20 = scalar_lea.vmem %s2009_s5, %s756_s10  ;;  %s389_s23 = scalar_lea.vmem %s2009_s5, %s757_s11  ;;  %v563_v27 = vstv %s1635_s9  ;;  %v565_v28 = vstv %s1633_s8 }
 0x199   :  { %v386_v10 = vld [vmem:[%s1643_s17] sm:$0xff]  ;;  %v758_v12 = vsel %vm1646_vm0, 1.0, %v825_v11  ;;  %v759_v13 = vsel %vm1651_vm1, 1.0, %v825_v11  ;;  %s762_s1 = sshll.u32 %s1627_s3, 3  ;;  %s763_s26 = sshll.u32 %s1629_s7, 3  ;;  %vm1691_vm5 = vcmp.eq.s32.totalorder %v1631_v4, %v563_v27  ;;  %vm1696_vm6 = vcmp.eq.s32.totalorder %v1631_v4, %v565_v28 }
 0x19a   :  { %v388_v14 = vld [vmem:[%s387_s20] sm:$0xff]  ;;  %v397_v15 = vmax.f32 %v383_v9, %v758_v12  ;;  %v400_v17 = vmax.f32 %v386_v10, %v759_v13  ;;  %v1703_v31 = vsel %vm1691_vm5, 1.0, %v825_v11  ;;  %v1708_v32 = vsel %vm1696_vm6, 1.0, %v825_v11  ;;  %s423_s27 = scalar_lea.vmem %s2009_s5, %s762_s1  ;;  %s425_s30 = scalar_lea.vmem %s2009_s5, %s763_s26 }
 0x19b   :  { %v390_v16 = vld [vmem:[%s389_s23] sm:$0xff]  ;;  %v401_v18 = vsel %vm1646_vm0, 0.0, %v388_v14  ;;  %vm1717_vm7 = vcmp.eq.s32.totalorder %v1631_v4, %v427_v25  ;;  %vm1722_vm8 = vcmp.eq.s32.totalorder %v1631_v4, %v429_v26  ;;  %s418_s7 = scalar_lea.vmem %s2008_s4, %s762_s1  ;;  %s1732_s12 = scalar_lea.vmem %s2008_s4, %s763_s26  ;;  %v461_v49 = vstv %s1740_s13 }
 0x19c   :  { %v403_v20 = vsel %vm1651_vm1, 0.0, %v390_v16  ;;  %v402_v21 = vadd.f32 %v401_v18, %v397_v15  ;;  %v764_v37 = vsel %vm1717_vm7, 1.0, %v825_v11  ;;  %v765_v38 = vsel %vm1722_vm8, 1.0, %v825_v11  ;;  %s769_s19 = sshll.u32 %s1740_s13, 3  ;;  %s773_s6 = sld [smem:[#allocation4 + $0x7]] }
 0x19d   :  { %v404_v22 = vadd.f32 %v403_v20, %v400_v17  ;;  %v597_v51 = vstv %s1751_s16  ;;  %v599_v52 = vstv %s1749_s15  ;;  %v631_v55 = vstv %s1755_s18  ;;  %s459_s1 = scalar_lea.vmem %s2009_s5, %s769_s19  ;;  %s455_s0 = scalar_lea.vmem %s2008_s4, %s769_s19 }
 0x19e   :  { %vm406_vm3 = vcmp.gt.f32.partialorder %v402_v21, %v1673_v19  ;;  %413 = vst.msk [vmem:[%s387_s20] sm:$0xff] %vm410_vm2, %v402_v21  ;;  %vm1771_vm11 = vcmp.eq.s32.totalorder %v1631_v4, %v597_v51  ;;  %vm1776_vm12 = vcmp.eq.s32.totalorder %v1631_v4, %v599_v52  ;;  %vm1793_vm13 = vcmp.eq.s32.totalorder %v1631_v4, %v631_v55  ;;  %s779_s26 = sld [smem:[#allocation4 + $0x9]] }
 0x19f   :  { %vm408_vm4 = vcmp.gt.f32.partialorder %v404_v22, %v1673_v19  ;;  %v407_v23 = vsel %vm406_vm3, 0.0, %v397_v15  ;;  %414 = vst.msk [vmem:[%s389_s23] sm:$0xff] %vm410_vm2, %v404_v22  ;;  %v1785_v57 = vsel %vm1771_vm11, 1.0, %v825_v11  ;;  %v1790_v58 = vsel %vm1776_vm12, 1.0, %v825_v11 }
 0x1a0   :  { %v409_v24 = vsel %vm408_vm4, 0.0, %v400_v17  ;;  %411 = vst.msk [vmem:[%s382_s14] sm:$0xff] %vm410_vm2, %v407_v23  ;;  %s1742_s14 = sld [smem:[#allocation4 + $0x4]]  ;;  %vm1803_vm15 = vcmp.eq.s32.totalorder %v1631_v4, %v461_v49  ;;  %v1815_v63 = vsel %vm1793_vm13, 1.0, %v825_v11 }
 0x1a1   :  { %412 = vst.msk [vmem:[%s1643_s17] sm:$0xff] %vm410_vm2, %v409_v24  ;;  %s1753_s17 = sld [smem:[#allocation4 + $0xe]]  ;;  %v770_v1 = vsel %vm1803_vm15, 1.0, %v825_v11 }
 0x1a2   :  { %v495_v17 = vstv %s773_s6 }
 0x1a3   :  { %vm1851_vm4 = vcmp.eq.s32.totalorder %v1631_v4, %v495_v17 }
 0x1a4   :  { %v776_v22 = vsel %vm1851_vm4, 1.0, %v825_v11 }
 0x1a6   :  { %v424_v35 = vld [vmem:[%s423_s27] sm:$0xff]  ;;  %v463_v50 = vstv %s1742_s14  ;;  %s768_s20 = sshll.u32 %s1742_s14, 3 }
 0x1a7   :  { %v426_v36 = vld [vmem:[%s425_s30] sm:$0xff]  ;;  %v437_v41 = vsel %vm1717_vm7, 0.0, %v424_v35  ;;  %v633_v56 = vstv %s1753_s17  ;;  %vm1808_vm0 = vcmp.eq.s32.totalorder %v1631_v4, %v463_v50  ;;  %s457_s23 = scalar_lea.vmem %s2009_s5, %s768_s20  ;;  %s452_s29 = scalar_lea.vmem %s2008_s4, %s768_s20 }
 0x1a8   :  { %v419_v39 = vld [vmem:[%s418_s7] sm:$0xff]  ;;  %v439_v42 = vsel %vm1722_vm8, 0.0, %v426_v36  ;;  %vm1798_vm14 = vcmp.eq.s32.totalorder %v1631_v4, %v633_v56  ;;  %v771_v2 = vsel %vm1808_vm0, 1.0, %v825_v11  ;;  %s787_s20 = sshll.u32 %s1635_s9, 3  ;;  %s793_s9 = sshll.u32 %s1751_s16, 3 }
 0x1a9   :  { %v422_v40 = vld [vmem:[%s1732_s12] sm:$0xff]  ;;  %v433_v43 = vmax.f32 %v419_v39, %v764_v37  ;;  %v1820_v0 = vsel %vm1798_vm14, 1.0, %v825_v11  ;;  %s591_s21 = scalar_lea.vmem %s2008_s4, %s793_s9  ;;  %s799_s16 = sshll.u32 %s1755_s18, 3 }
 0x1aa   :  { %v436_v44 = vmax.f32 %v422_v40, %v765_v38  ;;  %v529_v40 = vstv %s779_s26 }
 0x1ab   :  { %v438_v45 = vadd.f32 %v437_v41, %v433_v43 }
 0x1ac   :  { %v440_v46 = vadd.f32 %v439_v42, %v436_v44 }
 0x1ad   :  { %447 = vst.msk [vmem:[%s423_s27] sm:$0xff] %vm410_vm2, %v438_v45  ;;  %vm441_vm9 = vcmp.gt.f32.partialorder %v438_v45, %v1673_v19 }
 0x1ae   :  { %vm443_vm10 = vcmp.gt.f32.partialorder %v440_v46, %v1673_v19  ;;  %448 = vst.msk [vmem:[%s425_s30] sm:$0xff] %vm410_vm2, %v440_v46  ;;  %v442_v47 = vsel %vm441_vm9, 0.0, %v433_v43  ;;  %s772_s30 = sld [smem:[#allocation4 + $0x6]] }
 0x1af   :  { %v444_v48 = vsel %vm443_vm10, 0.0, %v436_v44  ;;  %445 = vst.msk [vmem:[%s418_s7] sm:$0xff] %vm410_vm2, %v442_v47  ;;  %s775_s7 = sshll.u32 %s773_s6, 3  ;;  %vm1889_vm10 = vcmp.eq.s32.totalorder %v1631_v4, %v529_v40 }
 0x1b0   :  { %446 = vst.msk [vmem:[%s1732_s12] sm:$0xff] %vm410_vm2, %v444_v48  ;;  %s493_s19 = scalar_lea.vmem %s2009_s5, %s775_s7  ;;  %s489_s25 = scalar_lea.vmem %s2008_s4, %s775_s7 }
 0x1b4   :  { %v497_v18 = vstv %s772_s30  ;;  %s774_s3 = sshll.u32 %s772_s30, 3 }
 0x1b5   :  { %v458_v3 = vld [vmem:[%s457_s23] sm:$0xff]  ;;  %vm1856_vm7 = vcmp.eq.s32.totalorder %v1631_v4, %v497_v18  ;;  %s491_s12 = scalar_lea.vmem %s2009_s5, %s774_s3  ;;  %s486_s22 = scalar_lea.vmem %s2008_s4, %s774_s3 }
 0x1b6   :  { %v460_v5 = vld [vmem:[%s459_s1] sm:$0xff]  ;;  %v471_v10 = vsel %vm1803_vm15, 0.0, %v458_v3  ;;  %v777_v23 = vsel %vm1856_vm7, 1.0, %v825_v11 }
 0x1b7   :  { %v456_v6 = vld [vmem:[%s455_s0] sm:$0xff]  ;;  %v473_v12 = vsel %vm1808_vm0, 0.0, %v460_v5 }
 0x1b8   :  { %v453_v7 = vld [vmem:[%s452_s29] sm:$0xff]  ;;  %v470_v9 = vmax.f32 %v456_v6, %v771_v2 }
 0x1b9   :  { %v467_v8 = vmax.f32 %v453_v7, %v770_v1 }
 0x1ba   :  { %v474_v14 = vadd.f32 %v473_v12, %v470_v9 }
 0x1bb   :  { %v472_v13 = vadd.f32 %v471_v10, %v467_v8 }
 0x1bc   :  { %vm477_vm3 = vcmp.gt.f32.partialorder %v474_v14, %v1673_v19 }
 0x1bd   :  { %481 = vst.msk [vmem:[%s457_s23] sm:$0xff] %vm410_vm2, %v472_v13  ;;  %vm475_vm1 = vcmp.gt.f32.partialorder %v472_v13, %v1673_v19  ;;  %v478_v16 = vsel %vm477_vm3, 0.0, %v470_v9 }
 0x1be   :  { %482 = vst.msk [vmem:[%s459_s1] sm:$0xff] %vm410_vm2, %v474_v14  ;;  %v476_v15 = vsel %vm475_vm1, 0.0, %v467_v8  ;;  %s778_s1 = sld [smem:[#allocation4 + $0x8]] }
 0x1bf   :  { %479 = vst.msk [vmem:[%s452_s29] sm:$0xff] %vm410_vm2, %v476_v15 }
 0x1c0   :  { %480 = vst.msk [vmem:[%s455_s0] sm:$0xff] %vm410_vm2, %v478_v16  ;;  %s781_s0 = sshll.u32 %s779_s26, 3  ;;  %s629_s26 = scalar_lea.vmem %s2009_s5, %s799_s16 }
 0x1c1   :  { %s527_s3 = scalar_lea.vmem %s2009_s5, %s781_s0  ;;  %s523_s14 = scalar_lea.vmem %s2008_s4, %s781_s0 }
 0x1c4   :  { %v531_v41 = vstv %s778_s1  ;;  %s780_s2 = sshll.u32 %s778_s1, 3  ;;  %s561_s1 = scalar_lea.vmem %s2009_s5, %s787_s20 }
 0x1c5   :  { %v492_v24 = vld [vmem:[%s491_s12] sm:$0xff]  ;;  %vm1894_vm15 = vcmp.eq.s32.totalorder %v1631_v4, %v531_v41  ;;  %s525_s29 = scalar_lea.vmem %s2009_s5, %s780_s2  ;;  %s520_s11 = scalar_lea.vmem %s2008_s4, %s780_s2  ;;  %v782_v4 = vsel %vm1889_vm10, 1.0, %v825_v11 }
 0x1c6   :  { %v494_v25 = vld [vmem:[%s493_s19] sm:$0xff]  ;;  %v505_v34 = vsel %vm1851_vm4, 0.0, %v492_v24  ;;  %v783_v44 = vsel %vm1894_vm15, 1.0, %v825_v11 }
 0x1c7   :  { %v487_v26 = vld [vmem:[%s486_s22] sm:$0xff]  ;;  %v507_v35 = vsel %vm1856_vm7, 0.0, %v494_v25 }
 0x1c8   :  { %v490_v27 = vld [vmem:[%s489_s25] sm:$0xff]  ;;  %v501_v28 = vmax.f32 %v487_v26, %v776_v22 }
 0x1c9   :  { %v504_v33 = vmax.f32 %v490_v27, %v777_v23 }
 0x1ca   :  { %v506_v36 = vadd.f32 %v505_v34, %v501_v28 }
 0x1cb   :  { %v508_v37 = vadd.f32 %v507_v35, %v504_v33 }
 0x1cc   :  { %vm509_vm8 = vcmp.gt.f32.partialorder %v506_v36, %v1673_v19  ;;  %515 = vst.msk [vmem:[%s491_s12] sm:$0xff] %vm410_vm2, %v506_v36 }
 0x1cd   :  { %vm511_vm9 = vcmp.gt.f32.partialorder %v508_v37, %v1673_v19  ;;  %v510_v38 = vsel %vm509_vm8, 0.0, %v501_v28  ;;  %516 = vst.msk [vmem:[%s493_s19] sm:$0xff] %vm410_vm2, %v508_v37  ;;  %s786_s19 = sshll.u32 %s1633_s8, 3  ;;  %s792_s8 = sshll.u32 %s1749_s15, 3 }
 0x1ce   :  { %v512_v39 = vsel %vm511_vm9, 0.0, %v504_v33  ;;  %513 = vst.msk [vmem:[%s486_s22] sm:$0xff] %vm410_vm2, %v510_v38  ;;  %s559_s23 = scalar_lea.vmem %s2009_s5, %s786_s19  ;;  %s554_s0 = scalar_lea.vmem %s2008_s4, %s786_s19 }
 0x1cf   :  { %514 = vst.msk [vmem:[%s489_s25] sm:$0xff] %vm410_vm2, %v512_v39  ;;  %s798_s15 = sshll.u32 %s1753_s17, 3 }
 0x1d0   :  { %s627_s24 = scalar_lea.vmem %s2009_s5, %s798_s15  ;;  %s622_s27 = scalar_lea.vmem %s2008_s4, %s798_s15 }
 0x1d4   :  { %v526_v45 = vld [vmem:[%s525_s29] sm:$0xff] }
 0x1d5   :  { %v528_v46 = vld [vmem:[%s527_s3] sm:$0xff]  ;;  %v539_v51 = vsel %vm1889_vm10, 0.0, %v526_v45 }
 0x1d6   :  { %v521_v47 = vld [vmem:[%s520_s11] sm:$0xff]  ;;  %v541_v52 = vsel %vm1894_vm15, 0.0, %v528_v46 }
 0x1d7   :  { %v524_v48 = vld [vmem:[%s523_s14] sm:$0xff]  ;;  %v535_v49 = vmax.f32 %v521_v47, %v782_v4 }
 0x1d8   :  { %v538_v50 = vmax.f32 %v524_v48, %v783_v44 }
 0x1d9   :  { %v540_v55 = vadd.f32 %v539_v51, %v535_v49 }
 0x1da   :  { %v542_v56 = vadd.f32 %v541_v52, %v538_v50 }
 0x1db   :  { %vm543_vm0 = vcmp.gt.f32.partialorder %v540_v55, %v1673_v19  ;;  %549 = vst.msk [vmem:[%s525_s29] sm:$0xff] %vm410_vm2, %v540_v55  ;;  %s557_s29 = scalar_lea.vmem %s2008_s4, %s787_s20 }
 0x1dc   :  { %vm545_vm1 = vcmp.gt.f32.partialorder %v542_v56, %v1673_v19  ;;  %v544_v11 = vsel %vm543_vm0, 0.0, %v535_v49  ;;  %550 = vst.msk [vmem:[%s527_s3] sm:$0xff] %vm410_vm2, %v542_v56  ;;  %s593_s3 = scalar_lea.vmem %s2009_s5, %s792_s8 }
 0x1dd   :  { %v546_v61 = vsel %vm545_vm1, 0.0, %v538_v50  ;;  %547 = vst.msk [vmem:[%s520_s11] sm:$0xff] %vm410_vm2, %v544_v11  ;;  %s595_s11 = scalar_lea.vmem %s2009_s5, %s793_s9 }
 0x1de   :  { %548 = vst.msk [vmem:[%s523_s14] sm:$0xff] %vm410_vm2, %v546_v61  ;;  %s588_s14 = scalar_lea.vmem %s2008_s4, %s792_s8  ;;  %s625_s8 = scalar_lea.vmem %s2008_s4, %s799_s16 }
 0x1e3   :  { %v560_v62 = vld [vmem:[%s559_s23] sm:$0xff] }
 0x1e4   :  { %v562_v1 = vld [vmem:[%s561_s1] sm:$0xff]  ;;  %v573_v7 = vsel %vm1691_vm5, 0.0, %v560_v62 }
 0x1e5   :  { %v555_v2 = vld [vmem:[%s554_s0] sm:$0xff]  ;;  %v575_v8 = vsel %vm1696_vm6, 0.0, %v562_v1 }
 0x1e6   :  { %v558_v3 = vld [vmem:[%s557_s29] sm:$0xff]  ;;  %v569_v5 = vmax.f32 %v555_v2, %v1703_v31 }
 0x1e7   :  { %v572_v6 = vmax.f32 %v558_v3, %v1708_v32 }
 0x1e8   :  { %v574_v9 = vadd.f32 %v573_v7, %v569_v5 }
 0x1e9   :  { %v576_v10 = vadd.f32 %v575_v8, %v572_v6 }
 0x1ea   :  { %vm577_vm3 = vcmp.gt.f32.partialorder %v574_v9, %v1673_v19  ;;  %583 = vst.msk [vmem:[%s559_s23] sm:$0xff] %vm410_vm2, %v574_v9 }
 0x1eb   :  { %vm579_vm4 = vcmp.gt.f32.partialorder %v576_v10, %v1673_v19  ;;  %v578_v12 = vsel %vm577_vm3, 0.0, %v569_v5  ;;  %584 = vst.msk [vmem:[%s561_s1] sm:$0xff] %vm410_vm2, %v576_v10 }
 0x1ec   :  { %v580_v13 = vsel %vm579_vm4, 0.0, %v572_v6  ;;  %581 = vst.msk [vmem:[%s554_s0] sm:$0xff] %vm410_vm2, %v578_v12 }
 0x1ed   :  { %582 = vst.msk [vmem:[%s557_s29] sm:$0xff] %vm410_vm2, %v580_v13 }
 0x1f2   :  { %v594_v29 = vld [vmem:[%s593_s3] sm:$0xff] }
 0x1f3   :  { %v596_v30 = vld [vmem:[%s595_s11] sm:$0xff]  ;;  %v607_v16 = vsel %vm1771_vm11, 0.0, %v594_v29 }
 0x1f4   :  { %v589_v31 = vld [vmem:[%s588_s14] sm:$0xff]  ;;  %v609_v17 = vsel %vm1776_vm12, 0.0, %v596_v30 }
 0x1f5   :  { %v592_v32 = vld [vmem:[%s591_s21] sm:$0xff]  ;;  %v603_v14 = vmax.f32 %v589_v31, %v1785_v57 }
 0x1f6   :  { %v606_v15 = vmax.f32 %v592_v32, %v1790_v58 }
 0x1f7   :  { %v608_v18 = vadd.f32 %v607_v16, %v603_v14 }
 0x1f8   :  { %v610_v20 = vadd.f32 %v609_v17, %v606_v15 }
 0x1f9   :  { %vm611_vm5 = vcmp.gt.f32.partialorder %v608_v18, %v1673_v19  ;;  %617 = vst.msk [vmem:[%s593_s3] sm:$0xff] %vm410_vm2, %v608_v18 }
 0x1fa   :  { %vm613_vm6 = vcmp.gt.f32.partialorder %v610_v20, %v1673_v19  ;;  %v612_v21 = vsel %vm611_vm5, 0.0, %v603_v14  ;;  %618 = vst.msk [vmem:[%s595_s11] sm:$0xff] %vm410_vm2, %v610_v20 }
 0x1fb   :  { %v614_v22 = vsel %vm613_vm6, 0.0, %v606_v15  ;;  %615 = vst.msk [vmem:[%s588_s14] sm:$0xff] %vm410_vm2, %v612_v21 }
 0x1fc   :  { %616 = vst.msk [vmem:[%s591_s21] sm:$0xff] %vm410_vm2, %v614_v22 }
 0x201   :  { %v628_v53 = vld [vmem:[%s627_s24] sm:$0xff] }
 0x202   :  { %v630_v54 = vld [vmem:[%s629_s26] sm:$0xff]  ;;  %v641_v25 = vsel %vm1793_vm13, 0.0, %v628_v53 }
 0x203   :  { %v623_v57 = vld [vmem:[%s622_s27] sm:$0xff]  ;;  %v643_v26 = vsel %vm1798_vm14, 0.0, %v630_v54 }
 0x204   :  { %v626_v58 = vld [vmem:[%s625_s8] sm:$0xff]  ;;  %v637_v23 = vmax.f32 %v623_v57, %v1815_v63 }
 0x205   :  { %v640_v24 = vmax.f32 %v626_v58, %v1820_v0 }
 0x206   :  { %v642_v27 = vadd.f32 %v641_v25, %v637_v23 }
 0x207   :  { %v644_v28 = vadd.f32 %v643_v26, %v640_v24 }
 0x208   :  { %vm645_vm11 = vcmp.gt.f32.partialorder %v642_v27, %v1673_v19  ;;  %651 = vst.msk [vmem:[%s627_s24] sm:$0xff] %vm410_vm2, %v642_v27 }
 0x209   :  { %vm647_vm12 = vcmp.gt.f32.partialorder %v644_v28, %v1673_v19  ;;  %v646_v33 = vsel %vm645_vm11, 0.0, %v637_v23  ;;  %652 = vst.msk [vmem:[%s629_s26] sm:$0xff] %vm410_vm2, %v644_v28 }
 0x20a   :  { %v648_v34 = vsel %vm647_vm12, 0.0, %v640_v24  ;;  %649 = vst.msk [vmem:[%s622_s27] sm:$0xff] %vm410_vm2, %v646_v33 }
 0x20b   :  { %650 = vst.msk [vmem:[%s625_s8] sm:$0xff] %vm410_vm2, %v648_v34 }
 0x20c   :  { %661 = vsyncpa [#allocation5], 1 }
 0x20d   :  { %662 = vsyncmov [#allocation2] }
 0x210   :  { %s663_s4 = vpop.sfrf %662 }
 0x211   :  { %p802_p5 = scmp.ne.s32.totalorder %s663_s4, 0 }
 0x213   :  { %667 = shalt.err (%p802_p5)  }
 0x214   :  { %669 = vsyncmov [#allocation2 + $0x1] }
 0x217   :  { %s670_s5 = vpop.sfrf %669 }
 0x218   :  { %p803_p6 = scmp.ne.s32.totalorder %s670_s5, 0 }
 0x21a   :  { %674 = shalt.err (%p803_p6)  }

</bundles_post_ra>
